<compile_context>
chip_gen: v7x
topology: tpu7x:2x2x1
jax: 0.10.0
libtpu: 0.0.40
codegen_flags: <defaults>
</compile_context>

<pallas_src>
import functools

import jax
import jax.numpy as jnp
import numpy as np
from jax.experimental import pallas as pl
from jax.experimental.pallas import tpu as pltpu

NEG_SLOPE = 0.01  # torch.nn.LeakyReLU default


def _leaky_relu(x):
    return jnp.where(x >= 0, x, NEG_SLOPE * x)


def bi_interaction_kernel(counts_ref, tiles_ref, a_ref, ego_ref,
                          w1_ref, b1_ref, w2_ref, b2_ref,
                          out_ref, acc_ref, *, tm, tk, max_tiles):
    """grid = (N // tm, max_nnz_col_tiles); axis 1 reduces A_in @ ego into acc_ref."""
    i = pl.program_id(0)
    k = pl.program_id(1)
    cnt = counts_ref[i]

    def _ego_tile(col):
        return ego_ref[pl.ds(pl.multiple_of(col * tk, tk), tk), :]

    # k == 0: write the first partial product directly into the accumulator
    # (saves a zero-fill + read-modify-write); zero-fill only for empty blocks.
    @pl.when(jnp.logical_and(k == 0, cnt > 0))
    def _():
        acc_ref[...] = jnp.dot(a_ref[...], _ego_tile(tiles_ref[i * max_tiles]),
                               preferred_element_type=jnp.float32)

    @pl.when(jnp.logical_and(k == 0, cnt == 0))
    def _():
        acc_ref[...] = jnp.zeros_like(acc_ref)

    # Accumulate only over genuine nonzero column tiles of this row block.
    @pl.when(jnp.logical_and(k > 0, k < cnt))
    def _():
        acc_ref[...] += jnp.dot(a_ref[...], _ego_tile(tiles_ref[i * max_tiles + k]),
                                preferred_element_type=jnp.float32)

    @pl.when(k == pl.num_programs(1) - 1)
    def _():
        ego_i = ego_ref[pl.ds(pl.multiple_of(i * tm, tm), tm), :].astype(jnp.float32)
        side = acc_ref[...]
        # Feed the finalize matmuls to the MXU in the weights' (compute) dtype.
        sum_in = (ego_i + side).astype(w1_ref.dtype)
        bi_in = (ego_i * side).astype(w2_ref.dtype)
        sum_pre = jnp.dot(sum_in, w1_ref[...],
                          preferred_element_type=jnp.float32) + b1_ref[...]
        bi_pre = jnp.dot(bi_in, w2_ref[...],
                         preferred_element_type=jnp.float32) + b2_ref[...]
        out_ref[...] = (_leaky_relu(sum_pre) + _leaky_relu(bi_pre)).astype(out_ref.dtype)


def _device_info():
    """Best-effort per-core VMEM capacity and multi-TensorCore detection."""
    vmem_cap = 128 << 20          # v5e / v6e default
    multi_core = False
    try:
        info = pltpu.get_tpu_info()
        vmem_cap = int(getattr(info, "vmem_capacity_bytes", vmem_cap))
    except Exception:
        pass
    try:
        kind = jax.devices()[0].device_kind.lower()
        multi_core = "v7" in kind
    except Exception:
        pass
    if vmem_cap <= (64 << 20):    # v7x-class part -> 2 TCs per chip
        multi_core = True
    return vmem_cap, multi_core


def _choose_tiles(n, tm, tk, multi_core):
    tm = min(tm, n)
    tk = min(tk, n)
    # Only multi-TensorCore parts (v7x) benefit from >= 2 row blocks for the
    # "parallel" axis; on single-TC v5e/v6e keep tm as large as VMEM allows.
    if multi_core:
        while n // tm < 2 and tm > 128:
            tm //= 2
    # TODO(synk): ragged N would need padding + output masking; hard-assert for now.
    assert n % tm == 0 and n % tk == 0, (n, tm, tk)
    assert tm % 8 == 0 and (tk % 128 == 0 or tk == n)
    return tm, tk


def _block_sparse_meta(a_np, tm, tk):
    """Per-row-block compacted list of nonzero column-tile indices (host side)."""
    n = a_np.shape[0]
    nbi, nbk = n // tm, n // tk
    nz = np.abs(a_np).reshape(nbi, tm, nbk, tk).sum(axis=(1, 3)) > 0
    counts = nz.sum(axis=1).astype(np.int32)
    max_tiles = max(int(counts.max()), 1)
    tile_ids = np.zeros((nbi, max_tiles), dtype=np.int32)
    for i in range(nbi):
        cols = np.nonzero(nz[i])[0]
        if cols.size:
            tile_ids[i, :cols.size] = cols
            # Padding repeats the last valid tile: identical consecutive block
            # indices let the pipeline skip the redundant DMA.
            tile_ids[i, cols.size:] = cols[-1]
    # Flattened 1D table: 2D SMEM arrays pad to [ceil(R/8)*8, ceil(C/128)*128].
    return counts, tile_ids.reshape(-1)


@functools.partial(
    jax.jit,
    static_argnames=("tm", "tk", "out_dtype", "use_buffered", "vmem_budget"))
def _aggregator_pallas(counts, tile_ids, a_in, ego, w1_t, b1, w2_t, b2,
                       *, tm, tk, out_dtype, use_buffered, vmem_budget):
    n, in_dim = ego.shape
    out_dim = w1_t.shape[1]
    nbi = n // tm
    max_tiles = tile_ids.shape[0] // nbi

    cb = ego.dtype.itemsize          # compute dtype bytes (bf16=2 / f32=4)
    wb = w1_t.dtype.itemsize
    ob = jnp.dtype(out_dtype).itemsize
    a_bufs = 3 if use_buffered else 2        # A_in tile pipelining depth
    c_bufs = 1 if use_buffered else 2        # constant-index blocks
    vmem_needed = (
        c_bufs * n * in_dim * cb             # resident ego
        + a_bufs * tm * tk * cb              # A_in tile
        + c_bufs * 2 * in_dim * out_dim * wb # W1^T, W2^T
        + c_bufs * 2 * 8 * out_dim * 4       # biases (padded to 8 sublanes)
        + 2 * tm * out_dim * ob              # output tile, double-buffered
        + tm * in_dim * 4                    # f32 accumulator scratch
    )
    assert vmem_needed <= vmem_budget, (
        "resident-ego layout exceeds the per-core VMEM budget; "
        "shrink tiles or stream ego instead", vmem_needed, vmem_budget)
    vmem_limit = int(min(max(2 * vmem_needed, 32 << 20), vmem_budget))

    def spec(shape, index_map, nbuf):
        if use_buffered:
            return pl.BlockSpec(shape, index_map, pipeline_mode=pl.Buffered(nbuf))
        return pl.BlockSpec(shape, index_map)

    kernel = functools.partial(bi_interaction_kernel, tm=tm, tk=tk, max_tiles=max_tiles)
    return pl.pallas_call(
        kernel,
        out_shape=jax.ShapeDtypeStruct((n, out_dim), out_dtype),
        grid_spec=pltpu.PrefetchScalarGridSpec(
            num_scalar_prefetch=2,
            grid=(nbi, max_tiles),
            in_specs=[
                # A_in tile: block-sparse column schedule via scalar prefetch.
                spec((tm, tk), lambda i, k, cnt, tl: (i, tl[i * max_tiles + k]), 3),
                # ego: fully VMEM-resident; k-tile and i-tile sliced in-kernel.
                spec((n, in_dim), lambda i, k, cnt, tl: (0, 0), 1),
                spec((in_dim, out_dim), lambda i, k, cnt, tl: (0, 0), 1),  # W1^T
                spec((1, out_dim), lambda i, k, cnt, tl: (0, 0), 1),       # b1
                spec((in_dim, out_dim), lambda i, k, cnt, tl: (0, 0), 1),  # W2^T
                spec((1, out_dim), lambda i, k, cnt, tl: (0, 0), 1),       # b2
            ],
            out_specs=pl.BlockSpec((tm, out_dim), lambda i, k, cnt, tl: (i, 0)),
            scratch_shapes=[pltpu.VMEM((tm, in_dim), jnp.float32)],
        ),
        compiler_params=pltpu.CompilerParams(
            dimension_semantics=("parallel", "arbitrary"),
            vmem_limit_bytes=vmem_limit),
    )(counts, tile_ids, a_in, ego, w1_t, b1, w2_t, b2)


def aggregator_bi_interaction(ego, a_in, w1_t, b1, w2_t, b2,
                              *, tm=256, tk=512, use_bf16=True):
    """ego: (N, in_dim), a_in: (N, N) dense, w*_t: (in_dim, out_dim), b*: (out_dim,)."""
    n, in_dim = ego.shape
    out_dim = w1_t.shape[1]

    vmem_cap, multi_core = _device_info()
    vmem_budget = max(32 << 20, (vmem_cap * 3) // 4)
    tm, tk = _choose_tiles(n, tm, tk, multi_core)

    counts, tile_ids = _block_sparse_meta(np.asarray(a_in), tm, tk)

    compute_dtype = jnp.bfloat16 if use_bf16 else jnp.float32
    out_dtype = jnp.dtype(ego.dtype)

    args = (jnp.asarray(counts), jnp.asarray(tile_ids),
            a_in.astype(compute_dtype), ego.astype(compute_dtype),
            w1_t.astype(compute_dtype), b1.reshape(1, out_dim).astype(jnp.float32),
            w2_t.astype(compute_dtype), b2.reshape(1, out_dim).astype(jnp.float32))
    kw = dict(tm=tm, tk=tk, out_dtype=out_dtype, vmem_budget=int(vmem_budget))
    try:
        return jax.block_until_ready(_aggregator_pallas(*args, use_buffered=True, **kw))
    except Exception:
        # TODO(synk): pl.Buffered pipeline_mode unsupported on this jax version;
        #             fall back to default double-buffered BlockSpecs.
        return jax.block_until_ready(_aggregator_pallas(*args, use_buffered=False, **kw))


def xavier_uniform(key, shape):
    # shape = (out_dim, in_dim) as in torch; gain = 1
    fan_out, fan_in = shape
    bound = float(np.sqrt(6.0 / (fan_in + fan_out)))
    return jax.random.uniform(key, shape, jnp.float32, -bound, bound)


def reference_np(ego, a_in, w1_t, b1, w2_t, b2):
    """float64 numpy golden — independent of XLA matmul precision."""
    ego = np.asarray(ego, np.float64)
    a = np.asarray(a_in, np.float64)
    w1 = np.asarray(w1_t, np.float64); b1 = np.asarray(b1, np.float64)
    w2 = np.asarray(w2_t, np.float64); b2 = np.asarray(b2, np.float64)

    def lrelu(x):
        return np.where(x >= 0, x, NEG_SLOPE * x)

    side = a @ ego
    s = lrelu((ego + side) @ w1 + b1)
    b = lrelu((ego * side) @ w2 + b2)
    return s + b


if __name__ == "__main__":
    N = 256        # n_users + n_entities
    IN_DIM = 128
    OUT_DIM = 128

    key = jax.random.PRNGKey(0)
    k_ego, k_a, k_w1, k_b1, k_w2, k_b2 = jax.random.split(key, 6)

    ego = jax.random.normal(k_ego, (N, IN_DIM), jnp.float32)
    # Sparse-ish normalized adjacency, densified for the kernel.
    a_dense = jax.random.uniform(k_a, (N, N), jnp.float32)
    a_in = jnp.where(a_dense > 0.9, a_dense, 0.0) / 10.0

    # nn.Linear weights: (out_dim, in_dim), xavier_uniform; biases uniform(+-1/sqrt(in_dim))
    w1 = xavier_uniform(k_w1, (OUT_DIM, IN_DIM))
    w2 = xavier_uniform(k_w2, (OUT_DIM, IN_DIM))
    bb = 1.0 / np.sqrt(IN_DIM)
    b1 = jax.random.uniform(k_b1, (OUT_DIM,), jnp.float32, -bb, bb)
    b2 = jax.random.uniform(k_b2, (OUT_DIM,), jnp.float32, -bb, bb)

    ref = reference_np(ego, a_in, w1.T, b1, w2.T, b2)

    # f32 compute path — tight-ish tolerance against the float64 golden.
    out_f32 = aggregator_bi_interaction(ego, a_in, w1.T, b1, w2.T, b2, use_bf16=False)
    out_f32 = jax.block_until_ready(out_f32)
    np.testing.assert_allclose(np.asarray(out_f32, np.float64), ref, rtol=1e-3, atol=1e-3)

    # Default fast path: bf16 MXU feed (A_in, ego, weights) with f32 accumulation.
    out_bf16 = aggregator_bi_interaction(ego, a_in, w1.T, b1, w2.T, b2)
    out_bf16 = jax.block_until_ready(out_bf16)
    np.testing.assert_allclose(np.asarray(out_bf16, np.float64), ref, rtol=5e-2, atol=5e-2)

    print("KERNEL_OK")
</pallas_src>

<mosaic_0001>
module attributes {stable_mosaic.version = 11 : i64} {
  func.func @bi_interaction_kernel(%arg0: i32, %arg1: i32, %arg2: memref<1xi32, #tpu.memory_space<smem>>, %arg3: memref<1xi32, #tpu.memory_space<smem>>, %arg4: memref<256x256xf32, #tpu.memory_space<vmem>>, %arg5: memref<256x128xf32, #tpu.memory_space<vmem>>, %arg6: memref<128x128xf32, #tpu.memory_space<vmem>>, %arg7: memref<1x128xf32, #tpu.memory_space<vmem>>, %arg8: memref<128x128xf32, #tpu.memory_space<vmem>>, %arg9: memref<1x128xf32, #tpu.memory_space<vmem>>, %arg10: memref<256x128xf32, #tpu.memory_space<vmem>>, %arg11: memref<256x128xf32, #tpu.memory_space<vmem>>) attributes {dimension_semantics = [#tpu.dimension_semantics<parallel>, #tpu.dimension_semantics<arbitrary>], iteration_bounds = array<i64: 1, 1>, scalar_prefetch = 2 : i64, scratch_operands = 1 : i64, tpu.core_type = #tpu.core_type<tc>, window_params = [{transform_indices = @transform_0, window_bounds = array<i64: 256, 256>}, {pipeline_mode = #tpu.pipeline_mode<synchronous>, transform_indices = @transform_1, window_bounds = array<i64: 256, 128>}, {pipeline_mode = #tpu.pipeline_mode<synchronous>, transform_indices = @transform_2, window_bounds = array<i64: 128, 128>}, {pipeline_mode = #tpu.pipeline_mode<synchronous>, transform_indices = @transform_3, window_bounds = array<i64: 1, 128>}, {pipeline_mode = #tpu.pipeline_mode<synchronous>, transform_indices = @transform_4, window_bounds = array<i64: 128, 128>}, {pipeline_mode = #tpu.pipeline_mode<synchronous>, transform_indices = @transform_5, window_bounds = array<i64: 1, 128>}, {transform_indices = @transform_6, window_bounds = array<i64: 256, 128>}]} {
    %0 = arith.index_cast %arg0 : i32 to index
    %1 = memref.load %arg2[%0] : memref<1xi32, #tpu.memory_space<smem>>
    %c0_i32 = arith.constant 0 : i32
    %2 = arith.cmpi eq, %arg1, %c0_i32 : i32
    %c0_i32_0 = arith.constant 0 : i32
    %3 = arith.cmpi sgt, %1, %c0_i32_0 : i32
    %4 = arith.andi %2, %3 : i1
    %5 = arith.extui %4 : i1 to i32
    %c0_i32_1 = arith.constant 0 : i32
    %6 = arith.cmpi ne, %5, %c0_i32_1 : i32
    scf.if %6 {
      %c0 = arith.constant 0 : index
      %c0_9 = arith.constant 0 : index
      %20 = vector.load %arg4[%c0, %c0_9] : memref<256x256xf32, #tpu.memory_space<vmem>>, vector<256x256xf32>
      %c1_i32 = arith.constant 1 : i32
      %21 = arith.muli %arg0, %c1_i32 : i32
      %22 = arith.index_cast %21 : i32 to index
      %23 = memref.load %arg3[%22] : memref<1xi32, #tpu.memory_space<smem>>
      %c256_i32 = arith.constant 256 : i32
      %24 = arith.muli %23, %c256_i32 : i32
      %25 = tpu.assume_multiple %24, 256 : i32
      %26 = arith.index_cast %25 : i32 to index
      %c0_10 = arith.constant 0 : index
      %27 = vector.load %arg5[%26, %c0_10] : memref<256x128xf32, #tpu.memory_space<vmem>>, vector<256x128xf32>
      %cst = arith.constant dense<0.000000e+00> : vector<256x128xf32>
      %28 = tpu.matmul %20, %27, %cst {dimension_numbers = #tpu.dot_dimension_numbers<[1], [0], [0], [1], [0, 0, 1, 1], [], []>} : vector<256x256xf32>, vector<256x128xf32>, vector<256x128xf32> -> vector<256x128xf32>
      %c0_11 = arith.constant 0 : index
      %c0_12 = arith.constant 0 : index
      %29 = vector.load %arg11[%c0_11, %c0_12] : memref<256x128xf32, #tpu.memory_space<vmem>>, vector<256x128xf32>
      tpu.vector_store %arg11[%c0_11, %c0_12], %28 {strides = array<i32>} : memref<256x128xf32, #tpu.memory_space<vmem>>, vector<256x128xf32>,
    } else {
    }
    %c0_i32_2 = arith.constant 0 : i32
    %7 = arith.cmpi eq, %arg1, %c0_i32_2 : i32
    %c0_i32_3 = arith.constant 0 : i32
    %8 = arith.cmpi eq, %1, %c0_i32_3 : i32
    %9 = arith.andi %7, %8 : i1
    %10 = arith.extui %9 : i1 to i32
    %c0_i32_4 = arith.constant 0 : i32
    %11 = arith.cmpi ne, %10, %c0_i32_4 : i32
    scf.if %11 {
      %cst = arith.constant 0.000000e+00 : f32
      %20 = vector.broadcast %cst : f32 to vector<256x128xf32>
      %c0 = arith.constant 0 : index
      %c0_9 = arith.constant 0 : index
      %21 = vector.load %arg11[%c0, %c0_9] : memref<256x128xf32, #tpu.memory_space<vmem>>, vector<256x128xf32>
      tpu.vector_store %arg11[%c0, %c0_9], %20 {strides = array<i32>} : memref<256x128xf32, #tpu.memory_space<vmem>>, vector<256x128xf32>,
    } else {
    }
    %c0_i32_5 = arith.constant 0 : i32
    %12 = arith.cmpi sgt, %arg1, %c0_i32_5 : i32
    %13 = arith.cmpi slt, %arg1, %1 : i32
    %14 = arith.andi %12, %13 : i1
    %15 = arith.extui %14 : i1 to i32
    %c0_i32_6 = arith.constant 0 : i32
    %16 = arith.cmpi ne, %15, %c0_i32_6 : i32
    scf.if %16 {
      %c0 = arith.constant 0 : index
      %c0_9 = arith.constant 0 : index
      %20 = vector.load %arg11[%c0, %c0_9] : memref<256x128xf32, #tpu.memory_space<vmem>>, vector<256x128xf32>
      %c0_10 = arith.constant 0 : index
      %c0_11 = arith.constant 0 : index
      %21 = vector.load %arg4[%c0_10, %c0_11] : memref<256x256xf32, #tpu.memory_space<vmem>>, vector<256x256xf32>
      %c1_i32 = arith.constant 1 : i32
      %22 = arith.muli %arg0, %c1_i32 : i32
      %23 = arith.addi %22, %arg1 : i32
      %24 = arith.index_cast %23 : i32 to index
      %25 = memref.load %arg3[%24] : memref<1xi32, #tpu.memory_space<smem>>
      %c256_i32 = arith.constant 256 : i32
      %26 = arith.muli %25, %c256_i32 : i32
      %27 = tpu.assume_multiple %26, 256 : i32
      %28 = arith.index_cast %27 : i32 to index
      %c0_12 = arith.constant 0 : index
      %29 = vector.load %arg5[%28, %c0_12] : memref<256x128xf32, #tpu.memory_space<vmem>>, vector<256x128xf32>
      %cst = arith.constant dense<0.000000e+00> : vector<256x128xf32>
      %30 = tpu.matmul %21, %29, %cst {dimension_numbers = #tpu.dot_dimension_numbers<[1], [0], [0], [1], [0, 0, 1, 1], [], []>} : vector<256x256xf32>, vector<256x128xf32>, vector<256x128xf32> -> vector<256x128xf32>
      %31 = arith.addf %20, %30 : vector<256x128xf32>
      %c0_13 = arith.constant 0 : index
      %c0_14 = arith.constant 0 : index
      %32 = vector.load %arg11[%c0_13, %c0_14] : memref<256x128xf32, #tpu.memory_space<vmem>>, vector<256x128xf32>
      tpu.vector_store %arg11[%c0_13, %c0_14], %31 {strides = array<i32>} : memref<256x128xf32, #tpu.memory_space<vmem>>, vector<256x128xf32>,
    } else {
    }
    %c0_i32_7 = arith.constant 0 : i32
    %17 = arith.cmpi eq, %arg1, %c0_i32_7 : i32
    %18 = arith.extui %17 : i1 to i32
    %c0_i32_8 = arith.constant 0 : i32
    %19 = arith.cmpi ne, %18, %c0_i32_8 : i32
    scf.if %19 {
      %c256_i32 = arith.constant 256 : i32
      %20 = arith.muli %arg0, %c256_i32 : i32
      %21 = tpu.assume_multiple %20, 256 : i32
      %22 = arith.index_cast %21 : i32 to index
      %c0 = arith.constant 0 : index
      %23 = vector.load %arg5[%22, %c0] : memref<256x128xf32, #tpu.memory_space<vmem>>, vector<256x128xf32>
      %c0_9 = arith.constant 0 : index
      %c0_10 = arith.constant 0 : index
      %24 = vector.load %arg11[%c0_9, %c0_10] : memref<256x128xf32, #tpu.memory_space<vmem>>, vector<256x128xf32>
      %25 = arith.addf %23, %24 : vector<256x128xf32>
      %26 = arith.mulf %23, %24 : vector<256x128xf32>
      %c0_11 = arith.constant 0 : index
      %c0_12 = arith.constant 0 : index
      %27 = vector.load %arg6[%c0_11, %c0_12] : memref<128x128xf32, #tpu.memory_space<vmem>>, vector<128x128xf32>
      %cst = arith.constant dense<0.000000e+00> : vector<256x128xf32>
      %28 = tpu.matmul %25, %27, %cst {dimension_numbers = #tpu.dot_dimension_numbers<[1], [0], [0], [1], [0, 0, 1, 1], [], []>} : vector<256x128xf32>, vector<128x128xf32>, vector<256x128xf32> -> vector<256x128xf32>
      %c0_13 = arith.constant 0 : index
      %c0_14 = arith.constant 0 : index
      %29 = vector.load %arg7[%c0_13, %c0_14] : memref<1x128xf32, #tpu.memory_space<vmem>>, vector<1x128xf32>
      %30 = vector.broadcast %29 : vector<1x128xf32> to vector<256x128xf32>
      %31 = arith.addf %28, %30 : vector<256x128xf32>
      %c0_15 = arith.constant 0 : index
      %c0_16 = arith.constant 0 : index
      %32 = vector.load %arg8[%c0_15, %c0_16] : memref<128x128xf32, #tpu.memory_space<vmem>>, vector<128x128xf32>
      %cst_17 = arith.constant dense<0.000000e+00> : vector<256x128xf32>
      %33 = tpu.matmul %26, %32, %cst_17 {dimension_numbers = #tpu.dot_dimension_numbers<[1], [0], [0], [1], [0, 0, 1, 1], [], []>} : vector<256x128xf32>, vector<128x128xf32>, vector<256x128xf32> -> vector<256x128xf32>
      %c0_18 = arith.constant 0 : index
      %c0_19 = arith.constant 0 : index
      %34 = vector.load %arg9[%c0_18, %c0_19] : memref<1x128xf32, #tpu.memory_space<vmem>>, vector<1x128xf32>
      %35 = vector.broadcast %34 : vector<1x128xf32> to vector<256x128xf32>
      %36 = arith.addf %33, %35 : vector<256x128xf32>
      %cst_20 = arith.constant 0.000000e+00 : f32
      %37 = vector.broadcast %cst_20 : f32 to vector<256x128xf32>
      %38 = arith.cmpf oge, %31, %37 : vector<256x128xf32>
      %cst_21 = arith.constant 0.00999999977 : f32
      %39 = vector.broadcast %cst_21 : f32 to vector<256x128xf32>
      %40 = arith.mulf %39, %31 : vector<256x128xf32>
      %41 = arith.select %38, %31, %40 : vector<256x128xi1>, vector<256x128xf32>
      %cst_22 = arith.constant 0.000000e+00 : f32
      %42 = vector.broadcast %cst_22 : f32 to vector<256x128xf32>
      %43 = arith.cmpf oge, %36, %42 : vector<256x128xf32>
      %cst_23 = arith.constant 0.00999999977 : f32
      %44 = vector.broadcast %cst_23 : f32 to vector<256x128xf32>
      %45 = arith.mulf %44, %36 : vector<256x128xf32>
      %46 = arith.select %43, %36, %45 : vector<256x128xi1>, vector<256x128xf32>
      %47 = arith.addf %41, %46 : vector<256x128xf32>
      %c0_24 = arith.constant 0 : index
      %c0_25 = arith.constant 0 : index
      %48 = vector.load %arg10[%c0_24, %c0_25] : memref<256x128xf32, #tpu.memory_space<vmem>>, vector<256x128xf32>
      tpu.vector_store %arg10[%c0_24, %c0_25], %47 {strides = array<i32>} : memref<256x128xf32, #tpu.memory_space<vmem>>, vector<256x128xf32>,
    } else {
    }
    return
  }
  func.func @transform_0(%arg0: i32, %arg1: i32, %arg2: memref<1xi32, #tpu.memory_space<smem>>, %arg3: memref<1xi32, #tpu.memory_space<smem>>) -> (i32, i32) {
    %c1_i32 = arith.constant 1 : i32
    %0 = arith.muli %arg0, %c1_i32 : i32
    %1 = arith.addi %0, %arg1 : i32
    %2 = arith.index_cast %1 : i32 to index
    %3 = memref.load %arg3[%2] : memref<1xi32, #tpu.memory_space<smem>>
    %c0_i32 = arith.constant 0 : i32
    return %arg0, %3 : i32, i32
  }
  func.func @transform_1(%arg0: i32, %arg1: i32, %arg2: memref<1xi32, #tpu.memory_space<smem>>, %arg3: memref<1xi32, #tpu.memory_space<smem>>) -> (i32, i32) {
    %c0_i32 = arith.constant 0 : i32
    %c0_i32_0 = arith.constant 0 : i32
    %c0_i32_1 = arith.constant 0 : i32
    return %c0_i32, %c0_i32_0 : i32, i32
  }
  func.func @transform_2(%arg0: i32, %arg1: i32, %arg2: memref<1xi32, #tpu.memory_space<smem>>, %arg3: memref<1xi32, #tpu.memory_space<smem>>) -> (i32, i32) {
    %c0_i32 = arith.constant 0 : i32
    %c0_i32_0 = arith.constant 0 : i32
    %c0_i32_1 = arith.constant 0 : i32
    return %c0_i32, %c0_i32_0 : i32, i32
  }
  func.func @transform_3(%arg0: i32, %arg1: i32, %arg2: memref<1xi32, #tpu.memory_space<smem>>, %arg3: memref<1xi32, #tpu.memory_space<smem>>) -> (i32, i32) {
    %c0_i32 = arith.constant 0 : i32
    %c0_i32_0 = arith.constant 0 : i32
    %c0_i32_1 = arith.constant 0 : i32
    return %c0_i32, %c0_i32_0 : i32, i32
  }
  func.func @transform_4(%arg0: i32, %arg1: i32, %arg2: memref<1xi32, #tpu.memory_space<smem>>, %arg3: memref<1xi32, #tpu.memory_space<smem>>) -> (i32, i32) {
    %c0_i32 = arith.constant 0 : i32
    %c0_i32_0 = arith.constant 0 : i32
    %c0_i32_1 = arith.constant 0 : i32
    return %c0_i32, %c0_i32_0 : i32, i32
  }
  func.func @transform_5(%arg0: i32, %arg1: i32, %arg2: memref<1xi32, #tpu.memory_space<smem>>, %arg3: memref<1xi32, #tpu.memory_space<smem>>) -> (i32, i32) {
    %c0_i32 = arith.constant 0 : i32
    %c0_i32_0 = arith.constant 0 : i32
    %c0_i32_1 = arith.constant 0 : i32
    return %c0_i32, %c0_i32_0 : i32, i32
  }
  func.func @transform_6(%arg0: i32, %arg1: i32, %arg2: memref<1xi32, #tpu.memory_space<smem>>, %arg3: memref<1xi32, #tpu.memory_space<smem>>) -> (i32, i32) {
    %c0_i32 = arith.constant 0 : i32
    %c0_i32_0 = arith.constant 0 : i32
    return %arg0, %c0_i32 : i32, i32
  }
}

</mosaic_0001>

<bundles_post_ra>
// kernel: _aggregator_pallas.1
= control target key start
LH: loop header
LB: loop body
LE: loop exit
PB: predicated region body
PF: predicated region fallthrough
CT: control target
= control target key end

     0   :  { %s2663_s0 = inlined_call_operand.<no memory space> [shape: s32[1], index: 0, kind: input, shape index: {}]   ;;  %s2664_s1 = inlined_call_operand.<no memory space> [shape: s32[1], index: 1, kind: input, shape index: {}]   ;;  %s2665_s2 = inlined_call_operand.hbm [shape: f32[256,256], index: 2, kind: input, shape index: {}]   ;;  %s2666_s3 = inlined_call_operand.hbm [shape: f32[256,128], index: 3, kind: input, shape index: {}]   ;;  %s2667_s4 = inlined_call_operand.hbm [shape: f32[128,128], index: 4, kind: input, shape index: {}]   ;;  %s2668_s5 = inlined_call_operand.vmem [shape: f32[1,128], index: 5, kind: input, shape index: {}]   ;;  %s2669_s6 = inlined_call_operand.hbm [shape: f32[128,128], index: 6, kind: input, shape index: {}]   ;;  %s2670_s7 = inlined_call_operand.vmem [shape: f32[1,128], index: 7, kind: input, shape index: {}]   ;;  %s2671_s8 = inlined_call_operand.hbm [shape: f32[256,128], index: 8, kind: output, shape index: {}]  }
   0x1   :  { %14 = sst [smem:[#allocation5]] %s2664_s1 }
   0x2   :  { %15 = vsyncpa [#allocation7], 0 }
   0x3   :  { %16 = vsyncpa [#allocation10], 0 }
   0x4   :  { %17 = vsyncpa [#allocation13], 0 }
   0x5   :  { %18 = vsyncpa [#allocation8], 0  ;;  %s2371_s29 = smov [#allocation9]   ;;  %s22_s9 = sld [smem:[#allocation5]] }
   0x6   :  { %s41_s30 = sshll.u32 %s2371_s29, 4  ;;  %s2251_s12 = scalar_lea.hbm %s2666_s3, 4096  ;;  %s42_s30 = int_to_ptr.vmem [resolvable:$true] %s41_s30 }
   0x7   :  { %p2252_p0 = scmp.ne.s32.totalorder %s2666_s3, %s2251_s12  ;;  %p2255_p1 = scmp.lt.u32.totalorder %s2251_s12, %s2666_s3 }
   0x9   :  { %p2257_p2 = pnand %p2255_p1, %p2252_p0 }
   0xb   :  { %2260 = shalt.err (!%p2257_p2)
}
   0xc   :  { %s2261_s1 = scalar_lea.vmem %s42_s30, 4096  ;;  %p2266_p4 = scmp.lt.s32.totalorder %s42_s30, %s42_s30 }
   0xd   :  { %p2262_p3 = scmp.ne.s32.totalorder %s42_s30, %s2261_s1  ;;  %p2267_p5 = scmp.lt.s32.totalorder %s2261_s1, %s2261_s1 }
   0xf   :  { %p2268_p6 = por %p2267_p5, %p2266_p4 }
  0x11   :  { %p2269_p7 = pnand %p2268_p6, %p2262_p3 }
  0x13   :  { %2272 = shalt.err (!%p2269_p7)
}
  0x14   :  { %s2372_s17 = smov 128   ;;  %s2373_s18 = smov 8  }
  0x15   :  { %47 = dma.hbm_to_vmem [thread:$0]  %s2666_s3, 4096, %s42_s30, [#allocation10], %s2372_s17, %s2372_s17, %s2373_s18  }
  0x16   :  { %s2374_s21 = smov [#allocation6]   ;;  %s2375_s23 = smov [#allocation11]  }
  0x17   :  { %s29_s22 = sshll.u32 %s2374_s21, 4  ;;  %s53_s24 = sshll.u32 %s2375_s23, 4  ;;  %s2445_s22 = int_to_ptr.vmem [resolvable:$true] %s29_s22  ;;  %s2447_s24 = int_to_ptr.vmem [resolvable:$true] %s53_s24 }
  0x18   :  { %s1837_s25 = sshll.u32 %s22_s9, 8  ;;  %s2376_s29 = smov [#allocation12]  }
  0x19   :  { %s28_s28 = scalar_lea.hbm %s2665_s2, %s1837_s25  ;;  %s2452_s10 = sshll.u32 %s2376_s29, 4  ;;  %s68_s10 = int_to_ptr.vmem [resolvable:$true] %s2452_s10 }
  0x1a   :  { %s2273_s11 = scalar_lea.hbm %s28_s28, 8192  ;;  %s2275_s30 = scalar_lea.hbm %s2665_s2, 8192 }
  0x1b   :  { %p2274_p8 = scmp.ne.s32.totalorder %s28_s28, %s2273_s11  ;;  %p2276_p9 = scmp.lt.u32.totalorder %s28_s28, %s2665_s2 }
  0x1c   :  { %p2277_p10 = scmp.lt.u32.totalorder %s2275_s30, %s2273_s11  ;;  %p2279_p12 = scmp.lt.u32.totalorder %s2273_s11, %s28_s28 }
  0x1e   :  { %p2278_p11 = por %p2277_p10, %p2276_p9 }
  0x20   :  { %p2280_p13 = por %p2279_p12, %p2278_p11 }
  0x22   :  { %p2281_p0 = pnand %p2280_p13, %p2274_p8 }
  0x24   :  { %2284 = shalt.err (!%p2281_p0)
}
  0x25   :  { %s2285_s9 = scalar_lea.vmem %s2445_s22, 8192  ;;  %p2290_p2 = scmp.lt.s32.totalorder %s2445_s22, %s2445_s22 }
  0x26   :  { %p2286_p1 = scmp.ne.s32.totalorder %s2445_s22, %s2285_s9  ;;  %p2291_p3 = scmp.lt.s32.totalorder %s2285_s9, %s2285_s9 }
  0x28   :  { %p2292_p4 = por %p2291_p3, %p2290_p2 }
  0x2a   :  { %p2293_p5 = pnand %p2292_p4, %p2286_p1 }
  0x2c   :  { %2296 = shalt.err (!%p2293_p5)
}
  0x2d   :  { %s2377_s15 = smov 256   ;;  %s2378_s2 = smov 16  }
  0x2e   :  { %35 = dma.hbm_to_vmem [thread:$0]  %s28_s28, 8192, %s2445_s22, [#allocation7], %s2377_s15, %s2377_s15, %s2378_s2  }
  0x2f   :  { %s2297_s19 = scalar_lea.hbm %s2667_s4, 2048 }
  0x30   :  { %p2298_p6 = scmp.ne.s32.totalorder %s2667_s4, %s2297_s19  ;;  %p2301_p7 = scmp.lt.u32.totalorder %s2297_s19, %s2667_s4 }
  0x32   :  { %p2303_p8 = pnand %p2301_p7, %p2298_p6 }
  0x34   :  { %2306 = shalt.err (!%p2303_p8)
}
  0x35   :  { %s2307_s26 = scalar_lea.vmem %s2447_s24, 2048  ;;  %p2312_p10 = scmp.lt.s32.totalorder %s2447_s24, %s2447_s24 }
  0x36   :  { %p2308_p9 = scmp.ne.s32.totalorder %s2447_s24, %s2307_s26  ;;  %p2313_p11 = scmp.lt.s32.totalorder %s2307_s26, %s2307_s26 }
  0x38   :  { %p2314_p12 = por %p2313_p11, %p2312_p10 }
  0x3a   :  { %p2315_p13 = pnand %p2314_p12, %p2308_p9 }
  0x3c   :  { %2318 = shalt.err (!%p2315_p13)
}
  0x3d   :  { %59 = dma.hbm_to_vmem [thread:$0]  %s2667_s4, 2048, %s2447_s24, [#allocation10], %s2372_s17, %s2372_s17, %s2373_s18  }
  0x3e   :  { %s2319_s11 = scalar_lea.hbm %s2669_s6, 2048 }
  0x3f   :  { %p2320_p0 = scmp.ne.s32.totalorder %s2669_s6, %s2319_s11  ;;  %p2323_p1 = scmp.lt.u32.totalorder %s2319_s11, %s2669_s6 }
  0x41   :  { %p2325_p2 = pnand %p2323_p1, %p2320_p0 }
  0x43   :  { %2328 = shalt.err (!%p2325_p2)
}
  0x44   :  { %s2329_s14 = scalar_lea.vmem %s68_s10, 2048  ;;  %p2334_p4 = scmp.lt.s32.totalorder %s68_s10, %s68_s10 }
  0x45   :  { %p2330_p3 = scmp.ne.s32.totalorder %s68_s10, %s2329_s14  ;;  %p2335_p5 = scmp.lt.s32.totalorder %s2329_s14, %s2329_s14 }
  0x47   :  { %p2336_p6 = por %p2335_p5, %p2334_p4 }
  0x49   :  { %p2337_p7 = pnand %p2336_p6, %p2330_p3 }
  0x4b   :  { %2340 = shalt.err (!%p2337_p7)
}
  0x4c   :  { %73 = dma.hbm_to_vmem [thread:$0]  %s2669_s6, 2048, %s68_s10, [#allocation13], %s2372_s17, %s2372_s17, %s2373_s18  }
  0x4d   :  { %2363 = dma.done.wait [#allocation7], 8192  }
  0x4e   :  { %2364 = vsyncadd [#allocation7], 4294959104 }
  0x4f   :  { %2365 = dma.done.wait [#allocation10], 6144  }
  0x50   :  { %2366 = vsyncadd [#allocation10], 4294961152 }
  0x51   :  { %2367 = dma.done.wait [#allocation13], 2048  }
  0x52   :  { %2368 = vsyncadd [#allocation13], 4294965248  ;;  %p93_p8 = scmp.gt.s32.totalorder %s2663_s0, 0 }
  0x53   :  { %s162_s2 = sld [smem:[#allocation5]] (%p93_p8)  ;;  %v99_v0 = vld [vmem:[#allocation6 + $0x8] sm:$0xff] (%p93_p8)  ;;  %v2379_v2 = vmov (%p93_p8), 0.0|0.0   ;;  %v98_v51 = vld [vmem:[#allocation6] sm:$0xff] (%p93_p8)  ;;  %v101_v53 = vld [vmem:[#allocation6 + $0x18] sm:$0xff] (%p93_p8) }
  0x54   :  { %97 = sbr.rel (!%p93_p8) target bundleno = 430 (0x1ae), region = 45  ;;  %v131_v1 = vld [vmem:[#allocation6 + $0x108] sm:$0xff] (%p93_p8)  ;;  %2096 = vmatprep.subr.bf16.mxu0 (%p93_p8), %v2379_v2  ;;  %2208 = vmatprep.subr.bf16.mxu1 (%p93_p8), %v2379_v2  ;;  %v130_v52 = vld [vmem:[#allocation6 + $0x100] sm:$0xff] (%p93_p8)  ;;  %v133_v54 = vld [vmem:[#allocation6 + $0x118] sm:$0xff] (%p93_p8) }
  0x55   :  { %261 = vmatprep.mubr.f32.mxu0 (%p93_p8), %v99_v0  ;;  %341 = vmatprep.mubr.f32.mxu1 (%p93_p8), %v131_v1  ;;  %v100_v55 = vld [vmem:[#allocation6 + $0x10] sm:$0xff] (%p93_p8)  ;;  %v103_v57 = vld [vmem:[#allocation6 + $0x28] sm:$0xff] (%p93_p8)  ;;  %v102_v59 = vld [vmem:[#allocation6 + $0x20] sm:$0xff] (%p93_p8) }
  0x56   :  { %v132_v56 = vld [vmem:[#allocation6 + $0x110] sm:$0xff] (%p93_p8)  ;;  %v135_v58 = vld [vmem:[#allocation6 + $0x128] sm:$0xff] (%p93_p8)  ;;  %v134_v60 = vld [vmem:[#allocation6 + $0x120] sm:$0xff] (%p93_p8) }
  0x57   :  { %v105_v61 = vld [vmem:[#allocation6 + $0x38] sm:$0xff] (%p93_p8)  ;;  %v104_v63 = vld [vmem:[#allocation6 + $0x30] sm:$0xff] (%p93_p8)  ;;  %v107_v1 = vld [vmem:[#allocation6 + $0x48] sm:$0xff] (%p93_p8) }
  0x58   :  { %v137_v62 = vld [vmem:[#allocation6 + $0x138] sm:$0xff] (%p93_p8)  ;;  %v136_v0 = vld [vmem:[#allocation6 + $0x130] sm:$0xff] (%p93_p8) }
  0x59   :  { %s1831_s6 = sshll.u32 (%p93_p8), %s162_s2, 8 }
  0x5a   :  { %s2506_s10 = scalar_lea.vmem (%p93_p8), [#allocation9], %s1831_s6 }
  0x5b   :  { %v165_v3 = vld [vmem:[%s2506_s10] sm:$0xff]  ;;  %v166_v4 = vld [vmem:[%s2506_s10 + $0x8] sm:$0xff]  ;;  %v167_v5 = vld [vmem:[%s2506_s10 + $0x10] sm:$0xff] }
  0x5c   :  { %v2097_v6 = vpack.c.bf16 %v166_v4, %v165_v3  ;;  %v168_v7 = vld [vmem:[%s2506_s10 + $0x18] sm:$0xff]  ;;  %v169_v9 = vld [vmem:[%s2506_s10 + $0x20] sm:$0xff]  ;;  %v170_v10 = vld [vmem:[%s2506_s10 + $0x28] sm:$0xff] }
  0x5d   :  { %v2100_v8 = vpack.c.bf16 %v168_v7, %v167_v5  ;;  %v2103_v11 = vpack.c.bf16 %v170_v10, %v169_v9  ;;  %v171_v12 = vld [vmem:[%s2506_s10 + $0x30] sm:$0xff]  ;;  %v172_v13 = vld [vmem:[%s2506_s10 + $0x38] sm:$0xff]  ;;  %v173_v15 = vld [vmem:[%s2506_s10 + $0x40] sm:$0xff] }
  0x5e   :  { %2098 = vmatpush1.bf16.msra.mxu0 %v2097_v6  ;;  %2224 = vmatpush1.bf16.msra.mxu1 %v2097_v6  ;;  %v2106_v14 = vpack.c.bf16 %v172_v13, %v171_v12  ;;  %v174_v16 = vld [vmem:[%s2506_s10 + $0x48] sm:$0xff]  ;;  %v175_v18 = vld [vmem:[%s2506_s10 + $0x50] sm:$0xff]  ;;  %v176_v19 = vld [vmem:[%s2506_s10 + $0x58] sm:$0xff] }
  0x5f   :  { %2099 = vmatprep.subr.bf16.mxu0 %v2379_v2  ;;  %2209 = vmatprep.subr.bf16.mxu1 %v2379_v2  ;;  %v2109_v17 = vpack.c.bf16 %v174_v16, %v173_v15  ;;  %v2112_v20 = vpack.c.bf16 %v176_v19, %v175_v18  ;;  %v177_v21 = vld [vmem:[%s2506_s10 + $0x60] sm:$0xff]  ;;  %v178_v22 = vld [vmem:[%s2506_s10 + $0x68] sm:$0xff]  ;;  %v179_v24 = vld [vmem:[%s2506_s10 + $0x70] sm:$0xff] }
  0x60   :  { %v2115_v23 = vpack.c.bf16 %v178_v22, %v177_v21  ;;  %v180_v25 = vld [vmem:[%s2506_s10 + $0x78] sm:$0xff]  ;;  %v181_v27 = vld [vmem:[%s2506_s10 + $0x80] sm:$0xff]  ;;  %v182_v28 = vld [vmem:[%s2506_s10 + $0x88] sm:$0xff] }
  0x61   :  { %v2118_v26 = vpack.c.bf16 %v180_v25, %v179_v24  ;;  %v2121_v29 = vpack.c.bf16 %v182_v28, %v181_v27  ;;  %v183_v30 = vld [vmem:[%s2506_s10 + $0x90] sm:$0xff]  ;;  %v184_v31 = vld [vmem:[%s2506_s10 + $0x98] sm:$0xff]  ;;  %v185_v33 = vld [vmem:[%s2506_s10 + $0xa0] sm:$0xff] }
  0x62   :  { %2101 = vmatpush1.bf16.msra.mxu0 %v2100_v8  ;;  %2225 = vmatpush1.bf16.msra.mxu1 %v2100_v8  ;;  %v2124_v32 = vpack.c.bf16 %v184_v31, %v183_v30  ;;  %v186_v34 = vld [vmem:[%s2506_s10 + $0xa8] sm:$0xff]  ;;  %v187_v36 = vld [vmem:[%s2506_s10 + $0xb0] sm:$0xff]  ;;  %v188_v37 = vld [vmem:[%s2506_s10 + $0xb8] sm:$0xff] }
  0x63   :  { %2102 = vmatprep.subr.bf16.mxu0 %v2379_v2  ;;  %2210 = vmatprep.subr.bf16.mxu1 %v2379_v2  ;;  %v2127_v35 = vpack.c.bf16 %v186_v34, %v185_v33  ;;  %v2130_v38 = vpack.c.bf16 %v188_v37, %v187_v36  ;;  %v189_v39 = vld [vmem:[%s2506_s10 + $0xc0] sm:$0xff]  ;;  %v190_v40 = vld [vmem:[%s2506_s10 + $0xc8] sm:$0xff]  ;;  %v191_v42 = vld [vmem:[%s2506_s10 + $0xd0] sm:$0xff] }
  0x64   :  { %v2133_v41 = vpack.c.bf16 %v190_v40, %v189_v39  ;;  %v192_v43 = vld [vmem:[%s2506_s10 + $0xd8] sm:$0xff]  ;;  %v193_v45 = vld [vmem:[%s2506_s10 + $0xe0] sm:$0xff]  ;;  %v194_v46 = vld [vmem:[%s2506_s10 + $0xe8] sm:$0xff] }
  0x65   :  { %v2136_v44 = vpack.c.bf16 %v192_v43, %v191_v42  ;;  %v2139_v47 = vpack.c.bf16 %v194_v46, %v193_v45  ;;  %v195_v48 = vld [vmem:[%s2506_s10 + $0xf0] sm:$0xff]  ;;  %v196_v49 = vld [vmem:[%s2506_s10 + $0xf8] sm:$0xff]  ;;  %v106_v3 = vld [vmem:[#allocation6 + $0x40] sm:$0xff] }
  0x66   :  { %2104 = vmatpush1.bf16.msra.mxu0 %v2103_v11  ;;  %2226 = vmatpush1.bf16.msra.mxu1 %v2103_v11  ;;  %v2142_v50 = vpack.c.bf16 %v196_v49, %v195_v48  ;;  %v138_v4 = vld [vmem:[#allocation6 + $0x140] sm:$0xff]  ;;  %v109_v5 = vld [vmem:[#allocation6 + $0x58] sm:$0xff]  ;;  %v108_v7 = vld [vmem:[#allocation6 + $0x50] sm:$0xff] }
  0x67   :  { %2105 = vmatprep.subr.bf16.mxu0 %v2379_v2  ;;  %2211 = vmatprep.subr.bf16.mxu1 %v2379_v2  ;;  %v141_v6 = vld [vmem:[#allocation6 + $0x158] sm:$0xff]  ;;  %v140_v8 = vld [vmem:[#allocation6 + $0x150] sm:$0xff]  ;;  %v111_v9 = vld [vmem:[#allocation6 + $0x68] sm:$0xff] }
  0x68   :  { %v143_v10 = vld [vmem:[#allocation6 + $0x168] sm:$0xff]  ;;  %v110_v11 = vld [vmem:[#allocation6 + $0x60] sm:$0xff]  ;;  %v113_v13 = vld [vmem:[#allocation6 + $0x78] sm:$0xff] }
  0x69   :  { %v142_v12 = vld [vmem:[#allocation6 + $0x160] sm:$0xff]  ;;  %v112_v15 = vld [vmem:[#allocation6 + $0x70] sm:$0xff]  ;;  %v147_v18 = vld [vmem:[#allocation6 + $0x188] sm:$0xff] }
  0x6a   :  { %2107 = vmatpush1.bf16.msra.mxu0 %v2106_v14  ;;  %2227 = vmatpush1.bf16.msra.mxu1 %v2106_v14  ;;  %v145_v14 = vld [vmem:[#allocation6 + $0x178] sm:$0xff]  ;;  %v144_v16 = vld [vmem:[#allocation6 + $0x170] sm:$0xff]  ;;  %v114_v19 = vld [vmem:[#allocation6 + $0x80] sm:$0xff] }
  0x6b   :  { %2108 = vmatprep.subr.bf16.mxu0 %v2379_v2  ;;  %2212 = vmatprep.subr.bf16.mxu1 %v2379_v2  ;;  %v117_v21 = vld [vmem:[#allocation6 + $0x98] sm:$0xff]  ;;  %v148_v24 = vld [vmem:[#allocation6 + $0x190] sm:$0xff]  ;;  %v119_v25 = vld [vmem:[#allocation6 + $0xa8] sm:$0xff] }
  0x6c   :  { %v149_v22 = vld [vmem:[#allocation6 + $0x198] sm:$0xff]  ;;  %v118_v27 = vld [vmem:[#allocation6 + $0xa0] sm:$0xff]  ;;  %v120_v31 = vld [vmem:[#allocation6 + $0xb0] sm:$0xff] }
  0x6d   :  { %v150_v28 = vld [vmem:[#allocation6 + $0x1a0] sm:$0xff]  ;;  %v153_v30 = vld [vmem:[#allocation6 + $0x1b8] sm:$0xff]  ;;  %v123_v33 = vld [vmem:[#allocation6 + $0xc8] sm:$0xff] }
  0x6e   :  { %2110 = vmatpush1.bf16.msra.mxu0 %v2109_v17  ;;  %2228 = vmatpush1.bf16.msra.mxu1 %v2109_v17  ;;  %v115_v17 = vld [vmem:[#allocation6 + $0x88] sm:$0xff]  ;;  %v154_v36 = vld [vmem:[#allocation6 + $0x1c0] sm:$0xff]  ;;  %v125_v37 = vld [vmem:[#allocation6 + $0xd8] sm:$0xff] }
  0x6f   :  { %2111 = vmatprep.subr.bf16.mxu0 %v2379_v2  ;;  %2213 = vmatprep.subr.bf16.mxu1 %v2379_v2  ;;  %v155_v34 = vld [vmem:[#allocation6 + $0x1c8] sm:$0xff]  ;;  %v124_v39 = vld [vmem:[#allocation6 + $0xd0] sm:$0xff]  ;;  %v126_v43 = vld [vmem:[#allocation6 + $0xe0] sm:$0xff] }
  0x70   :  { %v156_v40 = vld [vmem:[#allocation6 + $0x1d0] sm:$0xff]  ;;  %v159_v42 = vld [vmem:[#allocation6 + $0x1e8] sm:$0xff]  ;;  %v129_v45 = vld [vmem:[#allocation6 + $0xf8] sm:$0xff] }
  0x71   :  { %v161_v46 = vld [vmem:[#allocation6 + $0x1f8] sm:$0xff]  ;;  %v160_v48 = vld [vmem:[#allocation6 + $0x1f0] sm:$0xff] }
  0x72   :  { %2113 = vmatpush1.bf16.msra.mxu0 %v2112_v20  ;;  %2229 = vmatpush1.bf16.msra.mxu1 %v2112_v20  ;;  %v146_v20 = vld [vmem:[#allocation6 + $0x180] sm:$0xff] }
  0x73   :  { %2114 = vmatprep.subr.bf16.mxu0 %v2379_v2  ;;  %2214 = vmatprep.subr.bf16.mxu1 %v2379_v2 }
  0x76   :  { %2116 = vmatpush1.bf16.msra.mxu0 %v2115_v23  ;;  %2230 = vmatpush1.bf16.msra.mxu1 %v2115_v23  ;;  %v116_v23 = vld [vmem:[#allocation6 + $0x90] sm:$0xff] }
  0x77   :  { %2117 = vmatprep.subr.bf16.mxu0 %v2379_v2  ;;  %2215 = vmatprep.subr.bf16.mxu1 %v2379_v2 }
  0x7a   :  { %2119 = vmatpush1.bf16.msra.mxu0 %v2118_v26  ;;  %2231 = vmatpush1.bf16.msra.mxu1 %v2118_v26  ;;  %v151_v26 = vld [vmem:[#allocation6 + $0x1a8] sm:$0xff] }
  0x7b   :  { %2120 = vmatprep.subr.bf16.mxu0 %v2379_v2  ;;  %2216 = vmatprep.subr.bf16.mxu1 %v2379_v2 }
  0x7e   :  { %2122 = vmatpush1.bf16.msra.mxu0 %v2121_v29  ;;  %2232 = vmatpush1.bf16.msra.mxu1 %v2121_v29  ;;  %v121_v29 = vld [vmem:[#allocation6 + $0xb8] sm:$0xff] }
  0x7f   :  { %2123 = vmatprep.subr.bf16.mxu0 %v2379_v2  ;;  %2217 = vmatprep.subr.bf16.mxu1 %v2379_v2 }
  0x82   :  { %2125 = vmatpush1.bf16.msra.mxu0 %v2124_v32  ;;  %2233 = vmatpush1.bf16.msra.mxu1 %v2124_v32  ;;  %v152_v32 = vld [vmem:[#allocation6 + $0x1b0] sm:$0xff] }
  0x83   :  { %2126 = vmatprep.subr.bf16.mxu0 %v2379_v2  ;;  %2218 = vmatprep.subr.bf16.mxu1 %v2379_v2 }
  0x86   :  { %2128 = vmatpush1.bf16.msra.mxu0 %v2127_v35  ;;  %2234 = vmatpush1.bf16.msra.mxu1 %v2127_v35  ;;  %v122_v35 = vld [vmem:[#allocation6 + $0xc0] sm:$0xff] }
  0x87   :  { %2129 = vmatprep.subr.bf16.mxu0 %v2379_v2  ;;  %2219 = vmatprep.subr.bf16.mxu1 %v2379_v2 }
  0x8a   :  { %2131 = vmatpush1.bf16.msra.mxu0 %v2130_v38  ;;  %2235 = vmatpush1.bf16.msra.mxu1 %v2130_v38  ;;  %v157_v38 = vld [vmem:[#allocation6 + $0x1d8] sm:$0xff] }
  0x8b   :  { %2132 = vmatprep.subr.bf16.mxu0 %v2379_v2  ;;  %2220 = vmatprep.subr.bf16.mxu1 %v2379_v2 }
  0x8e   :  { %2134 = vmatpush1.bf16.msra.mxu0 %v2133_v41  ;;  %2236 = vmatpush1.bf16.msra.mxu1 %v2133_v41  ;;  %v127_v41 = vld [vmem:[#allocation6 + $0xe8] sm:$0xff] }
  0x8f   :  { %2135 = vmatprep.subr.bf16.mxu0 %v2379_v2  ;;  %2221 = vmatprep.subr.bf16.mxu1 %v2379_v2 }
  0x92   :  { %2137 = vmatpush1.bf16.msra.mxu0 %v2136_v44  ;;  %2237 = vmatpush1.bf16.msra.mxu1 %v2136_v44  ;;  %v158_v44 = vld [vmem:[#allocation6 + $0x1e0] sm:$0xff] }
  0x93   :  { %2138 = vmatprep.subr.bf16.mxu0 %v2379_v2  ;;  %2222 = vmatprep.subr.bf16.mxu1 %v2379_v2 }
  0x96   :  { %2140 = vmatpush1.bf16.msra.mxu0 %v2139_v47  ;;  %2238 = vmatpush1.bf16.msra.mxu1 %v2139_v47  ;;  %v128_v47 = vld [vmem:[#allocation6 + $0xf0] sm:$0xff] }
  0x97   :  { %2141 = vmatprep.subr.bf16.mxu0 %v2379_v2  ;;  %2223 = vmatprep.subr.bf16.mxu1 %v2379_v2  ;;  %v139_v2 = vld [vmem:[#allocation6 + $0x148] sm:$0xff] }
  0x9a   :  { %2143 = vmatpush1.bf16.msra.mxu0 %v2142_v50  ;;  %2239 = vmatpush1.bf16.msra.mxu1 %v2142_v50 }
  0x9d   :  { %262 = vmatmul.mubr.f32.vlgmr.msra.gmra.mrb[0].mxu0 %v98_v51  ;;  %342 = vmatmul.mubr.f32.vlgmr.msra.gmra.mrb[0].mxu1 %v130_v52 }
  0x9e   :  { %266 = vmatprep.mubr.f32.mxu0 %v101_v53  ;;  %346 = vmatprep.mubr.f32.mxu1 %v133_v54 }
  0xa1   :  { %267 = vmatmul.mubr.f32.gmra.mrb[2].mxu0 %v100_v55  ;;  %347 = vmatmul.mubr.f32.gmra.mrb[2].mxu1 %v132_v56 }
  0xa2   :  { %271 = vmatprep.mubr.f32.mxu0 %v103_v57  ;;  %351 = vmatprep.mubr.f32.mxu1 %v135_v58 }
  0xa5   :  { %272 = vmatmul.mubr.f32.gmra.mrb[4].mxu0 %v102_v59  ;;  %352 = vmatmul.mubr.f32.gmra.mrb[4].mxu1 %v134_v60 }
  0xa6   :  { %276 = vmatprep.mubr.f32.mxu0 %v105_v61  ;;  %356 = vmatprep.mubr.f32.mxu1 %v137_v62 }
  0xa9   :  { %277 = vmatmul.mubr.f32.gmra.mrb[6].mxu0 %v104_v63  ;;  %357 = vmatmul.mubr.f32.gmra.mrb[6].mxu1 %v136_v0 }
  0xaa   :  { %281 = vmatprep.mubr.f32.mxu0 %v107_v1  ;;  %361 = vmatprep.mubr.f32.mxu1 %v139_v2 }
  0xad   :  { %282 = vmatmul.mubr.f32.gmra.mrb[8].mxu0 %v106_v3  ;;  %362 = vmatmul.mubr.f32.gmra.mrb[8].mxu1 %v138_v4 }
  0xae   :  { %286 = vmatprep.mubr.f32.mxu0 %v109_v5  ;;  %366 = vmatprep.mubr.f32.mxu1 %v141_v6 }
  0xb1   :  { %287 = vmatmul.mubr.f32.gmra.mrb[10].mxu0 %v108_v7  ;;  %367 = vmatmul.mubr.f32.gmra.mrb[10].mxu1 %v140_v8 }
  0xb2   :  { %291 = vmatprep.mubr.f32.mxu0 %v111_v9  ;;  %371 = vmatprep.mubr.f32.mxu1 %v143_v10 }
  0xb5   :  { %292 = vmatmul.mubr.f32.gmra.mrb[12].mxu0 %v110_v11  ;;  %372 = vmatmul.mubr.f32.gmra.mrb[12].mxu1 %v142_v12 }
  0xb6   :  { %296 = vmatprep.mubr.f32.mxu0 %v113_v13  ;;  %376 = vmatprep.mubr.f32.mxu1 %v145_v14 }
  0xb9   :  { %297 = vmatmul.mubr.f32.gmra.mrb[14].mxu0 %v112_v15  ;;  %377 = vmatmul.mubr.f32.gmra.mrb[14].mxu1 %v144_v16 }
  0xba   :  { %301 = vmatprep.mubr.f32.mxu0 %v115_v17  ;;  %381 = vmatprep.mubr.f32.mxu1 %v147_v18 }
  0xbd   :  { %302 = vmatmul.mubr.f32.gmra.mrb[16].mxu0 %v114_v19  ;;  %382 = vmatmul.mubr.f32.gmra.mrb[16].mxu1 %v146_v20 }
  0xbe   :  { %306 = vmatprep.mubr.f32.mxu0 %v117_v21  ;;  %386 = vmatprep.mubr.f32.mxu1 %v149_v22 }
  0xc1   :  { %307 = vmatmul.mubr.f32.gmra.mrb[18].mxu0 %v116_v23  ;;  %387 = vmatmul.mubr.f32.gmra.mrb[18].mxu1 %v148_v24 }
  0xc2   :  { %311 = vmatprep.mubr.f32.mxu0 %v119_v25  ;;  %391 = vmatprep.mubr.f32.mxu1 %v151_v26 }
  0xc5   :  { %312 = vmatmul.mubr.f32.gmra.mrb[20].mxu0 %v118_v27  ;;  %392 = vmatmul.mubr.f32.gmra.mrb[20].mxu1 %v150_v28 }
  0xc6   :  { %316 = vmatprep.mubr.f32.mxu0 %v121_v29  ;;  %396 = vmatprep.mubr.f32.mxu1 %v153_v30 }
  0xc9   :  { %317 = vmatmul.mubr.f32.gmra.mrb[22].mxu0 %v120_v31  ;;  %397 = vmatmul.mubr.f32.gmra.mrb[22].mxu1 %v152_v32 }
  0xca   :  { %321 = vmatprep.mubr.f32.mxu0 %v123_v33  ;;  %401 = vmatprep.mubr.f32.mxu1 %v155_v34 }
  0xcd   :  { %322 = vmatmul.mubr.f32.gmra.mrb[24].mxu0 %v122_v35  ;;  %402 = vmatmul.mubr.f32.gmra.mrb[24].mxu1 %v154_v36 }
  0xce   :  { %326 = vmatprep.mubr.f32.mxu0 %v125_v37  ;;  %406 = vmatprep.mubr.f32.mxu1 %v157_v38 }
  0xd1   :  { %327 = vmatmul.mubr.f32.gmra.mrb[26].mxu0 %v124_v39  ;;  %407 = vmatmul.mubr.f32.gmra.mrb[26].mxu1 %v156_v40 }
  0xd2   :  { %331 = vmatprep.mubr.f32.mxu0 %v127_v41  ;;  %411 = vmatprep.mubr.f32.mxu1 %v159_v42 }
  0xd5   :  { %332 = vmatmul.mubr.f32.gmra.mrb[28].mxu0 %v126_v43  ;;  %412 = vmatmul.mubr.f32.gmra.mrb[28].mxu1 %v158_v44 }
  0xd6   :  { %336 = vmatprep.mubr.f32.mxu0 %v129_v45  ;;  %416 = vmatprep.mubr.f32.mxu1 %v161_v46 }
  0xd9   :  { %337 = vmatmul.mubr.f32.gmra.mrb[30].mxu0 %v128_v47  ;;  %417 = vmatmul.mubr.f32.gmra.mrb[30].mxu1 %v160_v48 }
 0x170   :  { %v263_v49 = vpop.f32.mrb[0].mxu0  ;;  %v343_v50 = vpop.f32.mrb[0].mxu1 }
 0x171   :  { %422 = vst [vmem:[#allocation2] sm:$0xff] %v263_v49  ;;  %438 = vst [vmem:[#allocation2 + $0x80] sm:$0xff] %v343_v50  ;;  %v265_v51 = vpop.f32.mrb[1].mxu0  ;;  %v345_v52 = vpop.f32.mrb[1].mxu1 }
 0x174   :  { %v268_v53 = vpop.f32.mrb[2].mxu0  ;;  %v348_v54 = vpop.f32.mrb[2].mxu1 }
 0x175   :  { %423 = vst [vmem:[#allocation2 + $0x8] sm:$0xff] %v268_v53  ;;  %439 = vst [vmem:[#allocation2 + $0x88] sm:$0xff] %v348_v54  ;;  %v270_v55 = vpop.f32.mrb[3].mxu0  ;;  %v350_v56 = vpop.f32.mrb[3].mxu1 }
 0x178   :  { %v273_v57 = vpop.f32.mrb[4].mxu0  ;;  %v353_v58 = vpop.f32.mrb[4].mxu1 }
 0x179   :  { %424 = vst [vmem:[#allocation2 + $0x10] sm:$0xff] %v273_v57  ;;  %440 = vst [vmem:[#allocation2 + $0x90] sm:$0xff] %v353_v58  ;;  %v275_v59 = vpop.f32.mrb[5].mxu0  ;;  %v355_v60 = vpop.f32.mrb[5].mxu1 }
 0x17c   :  { %v278_v61 = vpop.f32.mrb[6].mxu0  ;;  %v358_v62 = vpop.f32.mrb[6].mxu1 }
 0x17d   :  { %425 = vst [vmem:[#allocation2 + $0x18] sm:$0xff] %v278_v61  ;;  %441 = vst [vmem:[#allocation2 + $0x98] sm:$0xff] %v358_v62  ;;  %v280_v63 = vpop.f32.mrb[7].mxu0  ;;  %v360_v0 = vpop.f32.mrb[7].mxu1 }
 0x180   :  { %v283_v1 = vpop.f32.mrb[8].mxu0  ;;  %v363_v2 = vpop.f32.mrb[8].mxu1 }
 0x181   :  { %426 = vst [vmem:[#allocation2 + $0x20] sm:$0xff] %v283_v1  ;;  %442 = vst [vmem:[#allocation2 + $0xa0] sm:$0xff] %v363_v2  ;;  %v285_v3 = vpop.f32.mrb[9].mxu0  ;;  %v365_v4 = vpop.f32.mrb[9].mxu1 }
 0x184   :  { %v288_v5 = vpop.f32.mrb[10].mxu0  ;;  %v368_v6 = vpop.f32.mrb[10].mxu1 }
 0x185   :  { %427 = vst [vmem:[#allocation2 + $0x28] sm:$0xff] %v288_v5  ;;  %443 = vst [vmem:[#allocation2 + $0xa8] sm:$0xff] %v368_v6  ;;  %v290_v7 = vpop.f32.mrb[11].mxu0  ;;  %v370_v8 = vpop.f32.mrb[11].mxu1 }
 0x188   :  { %v293_v9 = vpop.f32.mrb[12].mxu0  ;;  %v373_v10 = vpop.f32.mrb[12].mxu1 }
 0x189   :  { %428 = vst [vmem:[#allocation2 + $0x30] sm:$0xff] %v293_v9  ;;  %444 = vst [vmem:[#allocation2 + $0xb0] sm:$0xff] %v373_v10  ;;  %v295_v11 = vpop.f32.mrb[13].mxu0  ;;  %v375_v12 = vpop.f32.mrb[13].mxu1 }
 0x18c   :  { %v298_v13 = vpop.f32.mrb[14].mxu0  ;;  %v378_v14 = vpop.f32.mrb[14].mxu1 }
 0x18d   :  { %429 = vst [vmem:[#allocation2 + $0x38] sm:$0xff] %v298_v13  ;;  %445 = vst [vmem:[#allocation2 + $0xb8] sm:$0xff] %v378_v14  ;;  %v300_v15 = vpop.f32.mrb[15].mxu0  ;;  %v380_v16 = vpop.f32.mrb[15].mxu1 }
 0x190   :  { %v303_v17 = vpop.f32.mrb[16].mxu0  ;;  %v383_v18 = vpop.f32.mrb[16].mxu1 }
 0x191   :  { %430 = vst [vmem:[#allocation2 + $0x40] sm:$0xff] %v303_v17  ;;  %446 = vst [vmem:[#allocation2 + $0xc0] sm:$0xff] %v383_v18  ;;  %v305_v19 = vpop.f32.mrb[17].mxu0  ;;  %v385_v20 = vpop.f32.mrb[17].mxu1 }
 0x194   :  { %v308_v21 = vpop.f32.mrb[18].mxu0  ;;  %v388_v22 = vpop.f32.mrb[18].mxu1 }
 0x195   :  { %431 = vst [vmem:[#allocation2 + $0x48] sm:$0xff] %v308_v21  ;;  %447 = vst [vmem:[#allocation2 + $0xc8] sm:$0xff] %v388_v22  ;;  %v310_v23 = vpop.f32.mrb[19].mxu0  ;;  %v390_v24 = vpop.f32.mrb[19].mxu1 }
 0x198   :  { %v313_v25 = vpop.f32.mrb[20].mxu0  ;;  %v393_v26 = vpop.f32.mrb[20].mxu1 }
 0x199   :  { %432 = vst [vmem:[#allocation2 + $0x50] sm:$0xff] %v313_v25  ;;  %448 = vst [vmem:[#allocation2 + $0xd0] sm:$0xff] %v393_v26  ;;  %v315_v27 = vpop.f32.mrb[21].mxu0  ;;  %v395_v28 = vpop.f32.mrb[21].mxu1 }
 0x19c   :  { %v318_v29 = vpop.f32.mrb[22].mxu0  ;;  %v398_v30 = vpop.f32.mrb[22].mxu1 }
 0x19d   :  { %433 = vst [vmem:[#allocation2 + $0x58] sm:$0xff] %v318_v29  ;;  %449 = vst [vmem:[#allocation2 + $0xd8] sm:$0xff] %v398_v30  ;;  %v320_v31 = vpop.f32.mrb[23].mxu0  ;;  %v400_v32 = vpop.f32.mrb[23].mxu1 }
 0x1a0   :  { %v323_v33 = vpop.f32.mrb[24].mxu0  ;;  %v403_v34 = vpop.f32.mrb[24].mxu1 }
 0x1a1   :  { %434 = vst [vmem:[#allocation2 + $0x60] sm:$0xff] %v323_v33  ;;  %450 = vst [vmem:[#allocation2 + $0xe0] sm:$0xff] %v403_v34  ;;  %v325_v35 = vpop.f32.mrb[25].mxu0  ;;  %v405_v36 = vpop.f32.mrb[25].mxu1 }
 0x1a4   :  { %v328_v37 = vpop.f32.mrb[26].mxu0  ;;  %v408_v38 = vpop.f32.mrb[26].mxu1 }
 0x1a5   :  { %435 = vst [vmem:[#allocation2 + $0x68] sm:$0xff] %v328_v37  ;;  %451 = vst [vmem:[#allocation2 + $0xe8] sm:$0xff] %v408_v38  ;;  %v330_v39 = vpop.f32.mrb[27].mxu0  ;;  %v410_v40 = vpop.f32.mrb[27].mxu1 }
 0x1a8   :  { %v333_v41 = vpop.f32.mrb[28].mxu0  ;;  %v413_v42 = vpop.f32.mrb[28].mxu1 }
 0x1a9   :  { %436 = vst [vmem:[#allocation2 + $0x70] sm:$0xff] %v333_v41  ;;  %452 = vst [vmem:[#allocation2 + $0xf0] sm:$0xff] %v413_v42  ;;  %v335_v43 = vpop.f32.mrb[29].mxu0  ;;  %v415_v44 = vpop.f32.mrb[29].mxu1 }
 0x1ac   :  { %v338_v45 = vpop.f32.mrb[30].mxu0  ;;  %v418_v46 = vpop.f32.mrb[30].mxu1 }
 0x1ad   :  { %437 = vst [vmem:[#allocation2 + $0x78] sm:$0xff] %v338_v45  ;;  %453 = vst [vmem:[#allocation2 + $0xf8] sm:$0xff] %v418_v46  ;;  %v340_v47 = vpop.f32.mrb[31].mxu0  ;;  %v420_v48 = vpop.f32.mrb[31].mxu1 }
 0x1ae PF:  { %p454_p9 = scmp.eq.s32.totalorder %s2663_s0, 0 }
 0x1af   :  { %v2380_v49 = vmov (%p454_p9), 0.0  }
 0x1b0   :  { %458 = sbr.rel (!%p454_p9) target bundleno = 448 (0x1c0), region = 49  ;;  %459 = vst [vmem:[#allocation2] sm:$0xff] (%p454_p9), %v2380_v49  ;;  %460 = vst [vmem:[#allocation2 + $0x8] sm:$0xff] (%p454_p9), %v2380_v49 }
 0x1b1   :  { %461 = vst [vmem:[#allocation2 + $0x10] sm:$0xff] (%p454_p9), %v2380_v49  ;;  %462 = vst [vmem:[#allocation2 + $0x18] sm:$0xff] (%p454_p9), %v2380_v49 }
 0x1b2   :  { %463 = vst [vmem:[#allocation2 + $0x20] sm:$0xff] (%p454_p9), %v2380_v49  ;;  %464 = vst [vmem:[#allocation2 + $0x28] sm:$0xff] (%p454_p9), %v2380_v49 }
 0x1b3   :  { %465 = vst [vmem:[#allocation2 + $0x30] sm:$0xff] (%p454_p9), %v2380_v49  ;;  %466 = vst [vmem:[#allocation2 + $0x38] sm:$0xff] (%p454_p9), %v2380_v49 }
 0x1b4   :  { %467 = vst [vmem:[#allocation2 + $0x40] sm:$0xff] (%p454_p9), %v2380_v49  ;;  %468 = vst [vmem:[#allocation2 + $0x48] sm:$0xff] (%p454_p9), %v2380_v49 }
 0x1b5   :  { %469 = vst [vmem:[#allocation2 + $0x50] sm:$0xff] (%p454_p9), %v2380_v49  ;;  %470 = vst [vmem:[#allocation2 + $0x58] sm:$0xff] (%p454_p9), %v2380_v49 }
 0x1b6   :  { %471 = vst [vmem:[#allocation2 + $0x60] sm:$0xff] (%p454_p9), %v2380_v49  ;;  %472 = vst [vmem:[#allocation2 + $0x68] sm:$0xff] (%p454_p9), %v2380_v49 }
 0x1b7   :  { %473 = vst [vmem:[#allocation2 + $0x70] sm:$0xff] %v2380_v49  ;;  %474 = vst [vmem:[#allocation2 + $0x78] sm:$0xff] %v2380_v49 }
 0x1b8   :  { %475 = vst [vmem:[#allocation2 + $0x80] sm:$0xff] %v2380_v49  ;;  %476 = vst [vmem:[#allocation2 + $0x88] sm:$0xff] %v2380_v49 }
 0x1b9   :  { %477 = vst [vmem:[#allocation2 + $0x90] sm:$0xff] %v2380_v49  ;;  %478 = vst [vmem:[#allocation2 + $0x98] sm:$0xff] %v2380_v49 }
 0x1ba   :  { %479 = vst [vmem:[#allocation2 + $0xa0] sm:$0xff] %v2380_v49  ;;  %480 = vst [vmem:[#allocation2 + $0xa8] sm:$0xff] %v2380_v49 }
 0x1bb   :  { %481 = vst [vmem:[#allocation2 + $0xb0] sm:$0xff] %v2380_v49  ;;  %482 = vst [vmem:[#allocation2 + $0xb8] sm:$0xff] %v2380_v49 }
 0x1bc   :  { %483 = vst [vmem:[#allocation2 + $0xc0] sm:$0xff] %v2380_v49  ;;  %484 = vst [vmem:[#allocation2 + $0xc8] sm:$0xff] %v2380_v49 }
 0x1bd   :  { %485 = vst [vmem:[#allocation2 + $0xd0] sm:$0xff] %v2380_v49  ;;  %486 = vst [vmem:[#allocation2 + $0xd8] sm:$0xff] %v2380_v49 }
 0x1be   :  { %487 = vst [vmem:[#allocation2 + $0xe0] sm:$0xff] %v2380_v49  ;;  %488 = vst [vmem:[#allocation2 + $0xe8] sm:$0xff] %v2380_v49 }
 0x1bf   :  { %489 = vst [vmem:[#allocation2 + $0xf0] sm:$0xff] %v2380_v49  ;;  %490 = vst [vmem:[#allocation2 + $0xf8] sm:$0xff] %v2380_v49 }
 0x1c0 PF:  { %v1051_v50 = vld [vmem:[#allocation11] sm:$0xff]  ;;  %v1052_v51 = vld [vmem:[#allocation11 + $0x8] sm:$0xff]  ;;  %v1053_v55 = vld [vmem:[#allocation11 + $0x10] sm:$0xff] }
 0x1c1   :  { %v1299_v52 = vld [vmem:[#allocation12] sm:$0xff]  ;;  %v2144_v53 = vpack.c.bf16 %v1052_v51, %v1051_v50  ;;  %v1300_v54 = vld [vmem:[#allocation12 + $0x8] sm:$0xff]  ;;  %v1054_v56 = vld [vmem:[#allocation11 + $0x18] sm:$0xff] }
 0x1c2   :  { %v2176_v57 = vpack.c.bf16 %v1300_v54, %v1299_v52  ;;  %v2148_v58 = vpack.c.bf16 %v1054_v56, %v1053_v55  ;;  %v1301_v59 = vld [vmem:[#allocation12 + $0x10] sm:$0xff]  ;;  %v1302_v60 = vld [vmem:[#allocation12 + $0x18] sm:$0xff]  ;;  %v1055_v61 = vld [vmem:[#allocation11 + $0x20] sm:$0xff] }
 0x1c3   :  { %2145 = vmatprep.subr.bf16.mxu0 %v2144_v53  ;;  %v2180_v62 = vpack.c.bf16 %v1302_v60, %v1301_v59  ;;  %v1056_v63 = vld [vmem:[#allocation11 + $0x28] sm:$0xff]  ;;  %v1303_v0 = vld [vmem:[#allocation12 + $0x20] sm:$0xff]  ;;  %v1057_v4 = vld [vmem:[#allocation11 + $0x30] sm:$0xff] }
 0x1c4   :  { %v1304_v1 = vld [vmem:[#allocation12 + $0x28] sm:$0xff]  ;;  %2177 = vmatprep.subr.bf16.mxu1 %v2176_v57  ;;  %2147 = vmatpush3.bf16.msra.mxu0 %v2144_v53  ;;  %v2152_v2 = vpack.c.bf16 %v1056_v63, %v1055_v61  ;;  %v1058_v5 = vld [vmem:[#allocation11 + $0x38] sm:$0xff]  ;;  %v1305_v6 = vld [vmem:[#allocation12 + $0x30] sm:$0xff] }
 0x1c5   :  { %2179 = vmatpush3.bf16.msra.mxu1 %v2176_v57  ;;  %2149 = vmatprep.subr.bf16.mxu0 %v2148_v58  ;;  %v2184_v3 = vpack.c.bf16 %v1304_v1, %v1303_v0  ;;  %v1306_v7 = vld [vmem:[#allocation12 + $0x38] sm:$0xff]  ;;  %v2156_v8 = vpack.c.bf16 %v1058_v5, %v1057_v4  ;;  %v1059_v10 = vld [vmem:[#allocation11 + $0x40] sm:$0xff]  ;;  %v1060_v11 = vld [vmem:[#allocation11 + $0x48] sm:$0xff] }
 0x1c6   :  { %2181 = vmatprep.subr.bf16.mxu1 %v2180_v62  ;;  %v2188_v9 = vpack.c.bf16 %v1306_v7, %v1305_v6  ;;  %v923_v12 = vld [vmem:[#allocation9] sm:$0xff]  ;;  %v1308_v14 = vld [vmem:[#allocation12 + $0x48] sm:$0xff]  ;;  %v2160_v18 = vpack.c.bf16 %v1060_v11, %v1059_v10  ;;  %v1061_v20 = vld [vmem:[#allocation11 + $0x50] sm:$0xff] }
 0x1c7   :  { %v1307_v13 = vld [vmem:[#allocation12 + $0x40] sm:$0xff]  ;;  %v1062_v21 = vld [vmem:[#allocation11 + $0x58] sm:$0xff]  ;;  %v1309_v22 = vld [vmem:[#allocation12 + $0x50] sm:$0xff] }
 0x1c8   :  { %2151 = vmatpush3.bf16.msra.mxu0 %v2148_v58  ;;  %v955_v15 = vld [vmem:[#allocation2] sm:$0xff]  ;;  %v2192_v19 = vpack.c.bf16 %v1308_v14, %v1307_v13  ;;  %v1310_v23 = vld [vmem:[#allocation12 + $0x58] sm:$0xff]  ;;  %v2164_v24 = vpack.c.bf16 %v1062_v21, %v1061_v20  ;;  %v1064_v27 = vld [vmem:[#allocation11 + $0x68] sm:$0xff] }
 0x1c9   :  { %2183 = vmatpush3.bf16.msra.mxu1 %v2180_v62  ;;  %2153 = vmatprep.subr.bf16.mxu0 %v2152_v2  ;;  %v987_v16 = vadd.f32 %v955_v15, %v923_v12  ;;  %v1019_v17 = vmul.f32 %v955_v15, %v923_v12  ;;  %v2196_v25 = vpack.c.bf16 %v1310_v23, %v1309_v22  ;;  %v1063_v26 = vld [vmem:[#allocation11 + $0x60] sm:$0xff]  ;;  %v1312_v29 = vld [vmem:[#allocation12 + $0x68] sm:$0xff]  ;;  %v1065_v32 = vld [vmem:[#allocation11 + $0x70] sm:$0xff] }
 0x1ca   :  { %2185 = vmatprep.subr.bf16.mxu1 %v2184_v3  ;;  %v1311_v28 = vld [vmem:[#allocation12 + $0x60] sm:$0xff]  ;;  %v2168_v30 = vpack.c.bf16 %v1064_v27, %v1063_v26  ;;  %v1066_v33 = vld [vmem:[#allocation11 + $0x78] sm:$0xff]  ;;  %v1313_v34 = vld [vmem:[#allocation12 + $0x70] sm:$0xff] }
 0x1cb   :  { %1968 = vmatprep.mubr.f32.mxu0 %v987_v16  ;;  %2048 = vmatprep.mubr.f32.mxu1 %v1019_v17  ;;  %v2200_v31 = vpack.c.bf16 %v1312_v29, %v1311_v28  ;;  %v1314_v35 = vld [vmem:[#allocation12 + $0x78] sm:$0xff]  ;;  %v2172_v36 = vpack.c.bf16 %v1066_v33, %v1065_v32  ;;  %v924_v38 = vld [vmem:[#allocation9 + $0x8] sm:$0xff]  ;;  %v925_v40 = vld [vmem:[#allocation9 + $0x10] sm:$0xff] }
 0x1cc   :  { %2155 = vmatpush3.bf16.msra.mxu0 %v2152_v2  ;;  %v2204_v37 = vpack.c.bf16 %v1314_v35, %v1313_v34  ;;  %v956_v39 = vld [vmem:[#allocation2 + $0x8] sm:$0xff]  ;;  %v957_v41 = vld [vmem:[#allocation2 + $0x10] sm:$0xff]  ;;  %v926_v45 = vld [vmem:[#allocation9 + $0x18] sm:$0xff] }
 0x1cd   :  { %2187 = vmatpush3.bf16.msra.mxu1 %v2184_v3  ;;  %2157 = vmatprep.subr.bf16.mxu0 %v2156_v8  ;;  %v988_v42 = vadd.f32 %v956_v39, %v924_v38  ;;  %v1020_v43 = vmul.f32 %v956_v39, %v924_v38  ;;  %v989_v44 = vadd.f32 %v957_v41, %v925_v40  ;;  %v958_v46 = vld [vmem:[#allocation2 + $0x18] sm:$0xff]  ;;  %v927_v48 = vld [vmem:[#allocation9 + $0x20] sm:$0xff]  ;;  %v928_v53 = vld [vmem:[#allocation9 + $0x28] sm:$0xff] }
 0x1ce   :  { %2189 = vmatprep.subr.bf16.mxu1 %v2188_v9  ;;  %v1021_v47 = vmul.f32 %v957_v41, %v925_v40  ;;  %v959_v49 = vld [vmem:[#allocation2 + $0x20] sm:$0xff]  ;;  %v990_v50 = vadd.f32 %v958_v46, %v926_v45  ;;  %v1022_v51 = vmul.f32 %v958_v46, %v926_v45  ;;  %v960_v54 = vld [vmem:[#allocation2 + $0x28] sm:$0xff]  ;;  %v929_v56 = vld [vmem:[#allocation9 + $0x30] sm:$0xff] }
 0x1cf   :  { %v991_v52 = vadd.f32 %v959_v49, %v927_v48  ;;  %v1023_v55 = vmul.f32 %v959_v49, %v927_v48  ;;  %v961_v57 = vld [vmem:[#allocation2 + $0x30] sm:$0xff]  ;;  %v992_v58 = vadd.f32 %v960_v54, %v928_v53  ;;  %v1024_v59 = vmul.f32 %v960_v54, %v928_v53  ;;  %v930_v61 = vld [vmem:[#allocation9 + $0x38] sm:$0xff]  ;;  %v931_v0 = vld [vmem:[#allocation9 + $0x40] sm:$0xff] }
 0x1d0   :  { %2159 = vmatpush3.bf16.msra.mxu0 %v2156_v8  ;;  %v993_v60 = vadd.f32 %v961_v57, %v929_v56  ;;  %v962_v62 = vld [vmem:[#allocation2 + $0x38] sm:$0xff]  ;;  %v1025_v63 = vmul.f32 %v961_v57, %v929_v56  ;;  %v963_v1 = vld [vmem:[#allocation2 + $0x40] sm:$0xff]  ;;  %v932_v5 = vld [vmem:[#allocation9 + $0x48] sm:$0xff] }
 0x1d1   :  { %2191 = vmatpush3.bf16.msra.mxu1 %v2188_v9  ;;  %2161 = vmatprep.subr.bf16.mxu0 %v2160_v18  ;;  %v994_v2 = vadd.f32 %v962_v62, %v930_v61  ;;  %v1026_v3 = vmul.f32 %v962_v62, %v930_v61  ;;  %v995_v4 = vadd.f32 %v963_v1, %v931_v0  ;;  %v964_v6 = vld [vmem:[#allocation2 + $0x48] sm:$0xff]  ;;  %v933_v8 = vld [vmem:[#allocation9 + $0x50] sm:$0xff]  ;;  %v934_v13 = vld [vmem:[#allocation9 + $0x58] sm:$0xff] }
 0x1d2   :  { %2193 = vmatprep.subr.bf16.mxu1 %v2192_v19  ;;  %v1027_v7 = vmul.f32 %v963_v1, %v931_v0  ;;  %v965_v9 = vld [vmem:[#allocation2 + $0x50] sm:$0xff]  ;;  %v996_v10 = vadd.f32 %v964_v6, %v932_v5  ;;  %v1028_v11 = vmul.f32 %v964_v6, %v932_v5  ;;  %v966_v14 = vld [vmem:[#allocation2 + $0x58] sm:$0xff]  ;;  %v935_v16 = vld [vmem:[#allocation9 + $0x60] sm:$0xff] }
 0x1d3   :  { %v997_v12 = vadd.f32 %v965_v9, %v933_v8  ;;  %v1029_v15 = vmul.f32 %v965_v9, %v933_v8  ;;  %v967_v17 = vld [vmem:[#allocation2 + $0x60] sm:$0xff]  ;;  %v936_v21 = vld [vmem:[#allocation9 + $0x68] sm:$0xff]  ;;  %v938_v29 = vld [vmem:[#allocation9 + $0x78] sm:$0xff] }
 0x1d4   :  { %2163 = vmatpush3.bf16.msra.mxu0 %v2160_v18  ;;  %v998_v18 = vadd.f32 %v966_v14, %v934_v13  ;;  %v999_v20 = vadd.f32 %v967_v17, %v935_v16  ;;  %v968_v22 = vld [vmem:[#allocation2 + $0x68] sm:$0xff]  ;;  %v1031_v23 = vmul.f32 %v967_v17, %v935_v16  ;;  %v939_v32 = vld [vmem:[#allocation9 + $0x80] sm:$0xff]  ;;  %v941_v40 = vld [vmem:[#allocation9 + $0x90] sm:$0xff] }
 0x1d5   :  { %2195 = vmatpush3.bf16.msra.mxu1 %v2192_v19  ;;  %2165 = vmatprep.subr.bf16.mxu0 %v2164_v24  ;;  %v1030_v19 = vmul.f32 %v966_v14, %v934_v13  ;;  %v1000_v26 = vadd.f32 %v968_v22, %v936_v21  ;;  %v1032_v27 = vmul.f32 %v968_v22, %v936_v21  ;;  %v971_v33 = vld [vmem:[#allocation2 + $0x80] sm:$0xff]  ;;  %v972_v38 = vld [vmem:[#allocation2 + $0x88] sm:$0xff]  ;;  %v973_v41 = vld [vmem:[#allocation2 + $0x90] sm:$0xff] }
 0x1d6   :  { %2197 = vmatprep.subr.bf16.mxu1 %v2196_v25  ;;  %v1035_v39 = vmul.f32 %v971_v33, %v939_v32  ;;  %v942_v45 = vld [vmem:[#allocation9 + $0x98] sm:$0xff]  ;;  %v943_v48 = vld [vmem:[#allocation9 + $0xa0] sm:$0xff]  ;;  %v944_v53 = vld [vmem:[#allocation9 + $0xa8] sm:$0xff] }
 0x1d7   :  { %v974_v46 = vld [vmem:[#allocation2 + $0x98] sm:$0xff]  ;;  %v975_v49 = vld [vmem:[#allocation2 + $0xa0] sm:$0xff]  ;;  %v976_v54 = vld [vmem:[#allocation2 + $0xa8] sm:$0xff] }
 0x1d8   :  { %2167 = vmatpush3.bf16.msra.mxu0 %v2164_v24  ;;  %v937_v24 = vld [vmem:[#allocation9 + $0x70] sm:$0xff]  ;;  %v946_v61 = vld [vmem:[#allocation9 + $0xb8] sm:$0xff]  ;;  %v947_v0 = vld [vmem:[#allocation9 + $0xc0] sm:$0xff] }
 0x1d9   :  { %2199 = vmatpush3.bf16.msra.mxu1 %v2196_v25  ;;  %2169 = vmatprep.subr.bf16.mxu0 %v2168_v30  ;;  %v969_v25 = vld [vmem:[#allocation2 + $0x70] sm:$0xff]  ;;  %v978_v62 = vld [vmem:[#allocation2 + $0xb8] sm:$0xff]  ;;  %v979_v1 = vld [vmem:[#allocation2 + $0xc0] sm:$0xff] }
 0x1da   :  { %2201 = vmatprep.subr.bf16.mxu1 %v2200_v31  ;;  %v1001_v28 = vadd.f32 %v969_v25, %v937_v24  ;;  %v945_v56 = vld [vmem:[#allocation9 + $0xb0] sm:$0xff]  ;;  %v948_v5 = vld [vmem:[#allocation9 + $0xc8] sm:$0xff]  ;;  %v950_v13 = vld [vmem:[#allocation9 + $0xd8] sm:$0xff] }
 0x1db   :  { %v977_v57 = vld [vmem:[#allocation2 + $0xb0] sm:$0xff]  ;;  %v980_v6 = vld [vmem:[#allocation2 + $0xc8] sm:$0xff]  ;;  %v982_v14 = vld [vmem:[#allocation2 + $0xd8] sm:$0xff] }
 0x1dc   :  { %2171 = vmatpush3.bf16.msra.mxu0 %v2168_v30  ;;  %v970_v30 = vld [vmem:[#allocation2 + $0x78] sm:$0xff]  ;;  %v949_v8 = vld [vmem:[#allocation9 + $0xd0] sm:$0xff]  ;;  %v951_v16 = vld [vmem:[#allocation9 + $0xe0] sm:$0xff] }
 0x1dd   :  { %2203 = vmatpush3.bf16.msra.mxu1 %v2200_v31  ;;  %2173 = vmatprep.subr.bf16.mxu0 %v2172_v36  ;;  %v1033_v31 = vmul.f32 %v969_v25, %v937_v24  ;;  %v1002_v34 = vadd.f32 %v970_v30, %v938_v29  ;;  %v1034_v35 = vmul.f32 %v970_v30, %v938_v29  ;;  %v981_v9 = vld [vmem:[#allocation2 + $0xd0] sm:$0xff]  ;;  %v983_v17 = vld [vmem:[#allocation2 + $0xe0] sm:$0xff]  ;;  %v952_v21 = vld [vmem:[#allocation9 + $0xe8] sm:$0xff] }
 0x1de   :  { %2205 = vmatprep.subr.bf16.mxu1 %v2204_v37  ;;  %v984_v22 = vld [vmem:[#allocation2 + $0xe8] sm:$0xff]  ;;  %v953_v24 = vld [vmem:[#allocation9 + $0xf0] sm:$0xff]  ;;  %v954_v29 = vld [vmem:[#allocation9 + $0xf8] sm:$0xff] }
 0x1df   :  { %v985_v25 = vld [vmem:[#allocation2 + $0xf0] sm:$0xff]  ;;  %v986_v30 = vld [vmem:[#allocation2 + $0xf8] sm:$0xff] }
 0x1e0   :  { %2175 = vmatpush3.bf16.msra.mxu0 %v2172_v36  ;;  %v1003_v36 = vadd.f32 %v971_v33, %v939_v32  ;;  %v1018_v32 = vadd.f32 %v986_v30, %v954_v29  ;;  %v1050_v33 = vmul.f32 %v986_v30, %v954_v29 }
 0x1e1   :  { %2207 = vmatpush3.bf16.msra.mxu1 %v2204_v37  ;;  %v940_v37 = vld [vmem:[#allocation9 + $0x88] sm:$0xff] }
 0x1e3   :  { %1969 = vmatmul.mubr.f32.vlgmr.msra.gmra.mrb[0].mxu0 %v988_v42  ;;  %v1004_v42 = vadd.f32 %v972_v38, %v940_v37 }
 0x1e4   :  { %2049 = vmatmul.mubr.f32.vlgmr.msra.gmra.mrb[0].mxu1 %v1020_v43  ;;  %1971 = vmatprep.mubr.f32.mxu0 %v989_v44  ;;  %v1036_v43 = vmul.f32 %v972_v38, %v940_v37  ;;  %v1005_v44 = vadd.f32 %v973_v41, %v941_v40 }
 0x1e5   :  { %2051 = vmatprep.mubr.f32.mxu1 %v1021_v47  ;;  %v1037_v47 = vmul.f32 %v973_v41, %v941_v40 }
 0x1e7   :  { %1972 = vmatmul.mubr.f32.gmra.mrb[2].mxu0 %v990_v50  ;;  %v1006_v50 = vadd.f32 %v974_v46, %v942_v45 }
 0x1e8   :  { %2052 = vmatmul.mubr.f32.gmra.mrb[2].mxu1 %v1022_v51  ;;  %1974 = vmatprep.mubr.f32.mxu0 %v991_v52  ;;  %v1038_v51 = vmul.f32 %v974_v46, %v942_v45  ;;  %v1007_v52 = vadd.f32 %v975_v49, %v943_v48 }
 0x1e9   :  { %2054 = vmatprep.mubr.f32.mxu1 %v1023_v55  ;;  %v1039_v55 = vmul.f32 %v975_v49, %v943_v48 }
 0x1eb   :  { %1975 = vmatmul.mubr.f32.gmra.mrb[4].mxu0 %v992_v58  ;;  %v1008_v58 = vadd.f32 %v976_v54, %v944_v53 }
 0x1ec   :  { %2055 = vmatmul.mubr.f32.gmra.mrb[4].mxu1 %v1024_v59  ;;  %1977 = vmatprep.mubr.f32.mxu0 %v993_v60  ;;  %v1040_v59 = vmul.f32 %v976_v54, %v944_v53  ;;  %v1009_v60 = vadd.f32 %v977_v57, %v945_v56 }
 0x1ed   :  { %2057 = vmatprep.mubr.f32.mxu1 %v1025_v63  ;;  %v1041_v63 = vmul.f32 %v977_v57, %v945_v56 }
 0x1ef   :  { %1978 = vmatmul.mubr.f32.gmra.mrb[6].mxu0 %v994_v2  ;;  %v1010_v2 = vadd.f32 %v978_v62, %v946_v61 }
 0x1f0   :  { %2058 = vmatmul.mubr.f32.gmra.mrb[6].mxu1 %v1026_v3  ;;  %1980 = vmatprep.mubr.f32.mxu0 %v995_v4  ;;  %v1042_v3 = vmul.f32 %v978_v62, %v946_v61  ;;  %v1011_v4 = vadd.f32 %v979_v1, %v947_v0 }
 0x1f1   :  { %2060 = vmatprep.mubr.f32.mxu1 %v1027_v7  ;;  %v1043_v7 = vmul.f32 %v979_v1, %v947_v0 }
 0x1f3   :  { %1981 = vmatmul.mubr.f32.gmra.mrb[8].mxu0 %v996_v10  ;;  %v1012_v10 = vadd.f32 %v980_v6, %v948_v5 }
 0x1f4   :  { %2061 = vmatmul.mubr.f32.gmra.mrb[8].mxu1 %v1028_v11  ;;  %1983 = vmatprep.mubr.f32.mxu0 %v997_v12  ;;  %v1044_v11 = vmul.f32 %v980_v6, %v948_v5  ;;  %v1013_v12 = vadd.f32 %v981_v9, %v949_v8 }
 0x1f5   :  { %2063 = vmatprep.mubr.f32.mxu1 %v1029_v15  ;;  %v1045_v15 = vmul.f32 %v981_v9, %v949_v8 }
 0x1f7   :  { %1984 = vmatmul.mubr.f32.gmra.mrb[10].mxu0 %v998_v18  ;;  %v1014_v18 = vadd.f32 %v982_v14, %v950_v13 }
 0x1f8   :  { %2064 = vmatmul.mubr.f32.gmra.mrb[10].mxu1 %v1030_v19  ;;  %1986 = vmatprep.mubr.f32.mxu0 %v999_v20  ;;  %v1046_v19 = vmul.f32 %v982_v14, %v950_v13  ;;  %v1015_v20 = vadd.f32 %v983_v17, %v951_v16 }
 0x1f9   :  { %2066 = vmatprep.mubr.f32.mxu1 %v1031_v23  ;;  %v1047_v23 = vmul.f32 %v983_v17, %v951_v16 }
 0x1fb   :  { %1987 = vmatmul.mubr.f32.gmra.mrb[12].mxu0 %v1000_v26  ;;  %v1016_v26 = vadd.f32 %v984_v22, %v952_v21 }
 0x1fc   :  { %2067 = vmatmul.mubr.f32.gmra.mrb[12].mxu1 %v1032_v27  ;;  %1989 = vmatprep.mubr.f32.mxu0 %v1001_v28  ;;  %v1048_v27 = vmul.f32 %v984_v22, %v952_v21  ;;  %v1017_v28 = vadd.f32 %v985_v25, %v953_v24 }
 0x1fd   :  { %2069 = vmatprep.mubr.f32.mxu1 %v1033_v31  ;;  %v1049_v31 = vmul.f32 %v985_v25, %v953_v24 }
 0x1ff   :  { %1990 = vmatmul.mubr.f32.gmra.mrb[14].mxu0 %v1002_v34  ;;  %v2576_v34 = vld [vmem:[%s2668_s5] ss:$0 sm:$0xff]  ;;  %s2381_s5 = smov [#allocation14]  }
 0x200   :  { %2070 = vmatmul.mubr.f32.gmra.mrb[14].mxu1 %v1034_v35  ;;  %1992 = vmatprep.mubr.f32.mxu0 %v1003_v36  ;;  %v2581_v35 = vld [vmem:[%s2670_s7] ss:$0 sm:$0xff]  ;;  %s1808_s7 = sshll.u32 %s2381_s5, 4  ;;  %s1809_s7 = int_to_ptr.vmem [resolvable:$true] %s1808_s7 }
 0x201   :  { %2072 = vmatprep.mubr.f32.mxu1 %v1035_v39  ;;  %s2341_s23 = scalar_lea.vmem %s1809_s7, 4096  ;;  %p2346_p11 = scmp.lt.s32.totalorder %s1809_s7, %s1809_s7 }
 0x202   :  { %p2342_p10 = scmp.ne.s32.totalorder %s1809_s7, %s2341_s23  ;;  %p2347_p12 = scmp.lt.s32.totalorder %s2341_s23, %s2341_s23 }
 0x203   :  { %1993 = vmatmul.mubr.f32.gmra.mrb[16].mxu0 %v1004_v42 }
 0x204   :  { %2073 = vmatmul.mubr.f32.gmra.mrb[16].mxu1 %v1036_v43  ;;  %1995 = vmatprep.mubr.f32.mxu0 %v1005_v44  ;;  %p2348_p13 = por %p2347_p12, %p2346_p11 }
 0x205   :  { %2075 = vmatprep.mubr.f32.mxu1 %v1037_v47 }
 0x206   :  { %p2349_p0 = pnand %p2348_p13, %p2342_p10 }
 0x207   :  { %1996 = vmatmul.mubr.f32.gmra.mrb[18].mxu0 %v1006_v50 }
 0x208   :  { %2076 = vmatmul.mubr.f32.gmra.mrb[18].mxu1 %v1038_v51  ;;  %1998 = vmatprep.mubr.f32.mxu0 %v1007_v52 }
 0x209   :  { %2078 = vmatprep.mubr.f32.mxu1 %v1039_v55 }
 0x20b   :  { %1999 = vmatmul.mubr.f32.gmra.mrb[20].mxu0 %v1008_v58 }
 0x20c   :  { %2079 = vmatmul.mubr.f32.gmra.mrb[20].mxu1 %v1040_v59  ;;  %2001 = vmatprep.mubr.f32.mxu0 %v1009_v60 }
 0x20d   :  { %2081 = vmatprep.mubr.f32.mxu1 %v1041_v63 }
 0x20f   :  { %2002 = vmatmul.mubr.f32.gmra.mrb[22].mxu0 %v1010_v2 }
 0x210   :  { %2082 = vmatmul.mubr.f32.gmra.mrb[22].mxu1 %v1042_v3  ;;  %2004 = vmatprep.mubr.f32.mxu0 %v1011_v4 }
 0x211   :  { %2084 = vmatprep.mubr.f32.mxu1 %v1043_v7 }
 0x213   :  { %2005 = vmatmul.mubr.f32.gmra.mrb[24].mxu0 %v1012_v10 }
 0x214   :  { %2085 = vmatmul.mubr.f32.gmra.mrb[24].mxu1 %v1044_v11  ;;  %2007 = vmatprep.mubr.f32.mxu0 %v1013_v12 }
 0x215   :  { %2087 = vmatprep.mubr.f32.mxu1 %v1045_v15 }
 0x217   :  { %2008 = vmatmul.mubr.f32.gmra.mrb[26].mxu0 %v1014_v18 }
 0x218   :  { %2088 = vmatmul.mubr.f32.gmra.mrb[26].mxu1 %v1046_v19  ;;  %2010 = vmatprep.mubr.f32.mxu0 %v1015_v20 }
 0x219   :  { %2090 = vmatprep.mubr.f32.mxu1 %v1047_v23 }
 0x21b   :  { %2011 = vmatmul.mubr.f32.gmra.mrb[28].mxu0 %v1016_v26 }
 0x21c   :  { %2091 = vmatmul.mubr.f32.gmra.mrb[28].mxu1 %v1048_v27  ;;  %2013 = vmatprep.mubr.f32.mxu0 %v1017_v28 }
 0x21d   :  { %2093 = vmatprep.mubr.f32.mxu1 %v1049_v31 }
 0x21f   :  { %2014 = vmatmul.mubr.f32.gmra.mrb[30].mxu0 %v1018_v32 }
 0x220   :  { %2094 = vmatmul.mubr.f32.gmra.mrb[30].mxu1 %v1050_v33 }
 0x2b6   :  { %v1970_v36 = vpop.f32.mrb[0].mxu0 }
 0x2b7   :  { %v1146_v37 = vadd.f32 %v1970_v36, %v2576_v34  ;;  %v2050_v38 = vpop.f32.mrb[0].mxu1  ;;  %v1140_v39 = vpop.f32.mrb[1].mxu0 }
 0x2b8   :  { %v1394_v40 = vadd.f32 %v2050_v38, %v2581_v35  ;;  %v1141_v41 = vadd.f32 %v2576_v34, %v1140_v39  ;;  %v1388_v42 = vpop.f32.mrb[1].mxu1 }
 0x2b9   :  { %vm1548_vm0 = vcmp.ge.f32.partialorder %v1146_v37, 0.0  ;;  %v1580_v43 = vmul.f32 0.01, %v1146_v37  ;;  %v1389_v44 = vadd.f32 %v2581_v35, %v1388_v42 }
 0x2ba   :  { %vm1644_vm1 = vcmp.ge.f32.partialorder %v1394_v40, 0.0  ;;  %v1676_v45 = vmul.f32 0.01, %v1394_v40  ;;  %vm1547_vm2 = vcmp.ge.f32.partialorder %v1141_v41, 0.0  ;;  %v1579_v46 = vmul.f32 0.01, %v1141_v41 }
 0x2bb   :  { %v1612_v47 = vsel %vm1548_vm0, %v1146_v37, %v1580_v43  ;;  %vm1643_vm3 = vcmp.ge.f32.partialorder %v1389_v44, 0.0  ;;  %v1675_v48 = vmul.f32 0.01, %v1389_v44  ;;  %v1973_v49 = vpop.f32.mrb[2].mxu0  ;;  %v2053_v50 = vpop.f32.mrb[2].mxu1 }
 0x2bc   :  { %v1708_v51 = vsel %vm1644_vm1, %v1394_v40, %v1676_v45  ;;  %v1611_v52 = vsel %vm1547_vm2, %v1141_v41, %v1579_v46  ;;  %v1156_v53 = vadd.f32 %v1973_v49, %v2576_v34  ;;  %v1404_v54 = vadd.f32 %v2053_v50, %v2581_v35  ;;  %v1150_v55 = vpop.f32.mrb[3].mxu0  ;;  %v1398_v56 = vpop.f32.mrb[3].mxu1 }
 0x2bd   :  { %v1740_v57 = vadd.f32 %v1708_v51, %v1612_v47  ;;  %v1707_v58 = vsel %vm1643_vm3, %v1389_v44, %v1675_v48  ;;  %v1151_v59 = vadd.f32 %v2576_v34, %v1150_v55  ;;  %v1399_v60 = vadd.f32 %v2581_v35, %v1398_v56 }
 0x2be   :  { %v1739_v61 = vadd.f32 %v1707_v58, %v1611_v52  ;;  %vm1550_vm4 = vcmp.ge.f32.partialorder %v1156_v53, 0.0  ;;  %v1582_v62 = vmul.f32 0.01, %v1156_v53  ;;  %vm1646_vm5 = vcmp.ge.f32.partialorder %v1404_v54, 0.0  ;;  %v1976_v63 = vpop.f32.mrb[4].mxu0 }
 0x2bf   :  { %1772 = vst [vmem:[#allocation14 + $0x8] sm:$0xff] %v1740_v57  ;;  %v1678_v0 = vmul.f32 0.01, %v1404_v54  ;;  %vm1549_vm6 = vcmp.ge.f32.partialorder %v1151_v59, 0.0  ;;  %v1581_v1 = vmul.f32 0.01, %v1151_v59  ;;  %v1166_v4 = vadd.f32 %v1976_v63, %v2576_v34 }
 0x2c0   :  { %vm1645_vm7 = vcmp.ge.f32.partialorder %v1399_v60, 0.0  ;;  %1771 = vst [vmem:[#allocation14] sm:$0xff] %v1739_v61  ;;  %v1614_v2 = vsel %vm1550_vm4, %v1156_v53, %v1582_v62  ;;  %v1677_v3 = vmul.f32 0.01, %v1399_v60  ;;  %v2056_v5 = vpop.f32.mrb[4].mxu1  ;;  %v1160_v6 = vpop.f32.mrb[5].mxu0 }
 0x2c1   :  { %v1710_v7 = vsel %vm1646_vm5, %v1404_v54, %v1678_v0  ;;  %v1613_v8 = vsel %vm1549_vm6, %v1151_v59, %v1581_v1  ;;  %v1414_v9 = vadd.f32 %v2056_v5, %v2581_v35  ;;  %v1161_v10 = vadd.f32 %v2576_v34, %v1160_v6  ;;  %v1408_v11 = vpop.f32.mrb[5].mxu1 }
 0x2c2   :  { %v1742_v12 = vadd.f32 %v1710_v7, %v1614_v2  ;;  %v1709_v13 = vsel %vm1645_vm7, %v1399_v60, %v1677_v3  ;;  %vm1552_vm8 = vcmp.ge.f32.partialorder %v1166_v4, 0.0  ;;  %v1584_v14 = vmul.f32 0.01, %v1166_v4  ;;  %v1979_v15 = vpop.f32.mrb[6].mxu0 }
 0x2c3   :  { %v1741_v16 = vadd.f32 %v1709_v13, %v1613_v8  ;;  %vm1648_vm9 = vcmp.ge.f32.partialorder %v1414_v9, 0.0  ;;  %v1680_v17 = vmul.f32 0.01, %v1414_v9  ;;  %vm1551_vm10 = vcmp.ge.f32.partialorder %v1161_v10, 0.0  ;;  %v2059_v18 = vpop.f32.mrb[6].mxu1  ;;  %v1170_v19 = vpop.f32.mrb[7].mxu0 }
 0x2c4   :  { %1774 = vst [vmem:[#allocation14 + $0x18] sm:$0xff] %v1742_v12  ;;  %v1616_v20 = vsel %vm1552_vm8, %v1166_v4, %v1584_v14  ;;  %v1583_v21 = vmul.f32 0.01, %v1161_v10  ;;  %v1409_v22 = vadd.f32 %v2581_v35, %v1408_v11  ;;  %v1176_v23 = vadd.f32 %v1979_v15, %v2576_v34  ;;  %v1418_v24 = vpop.f32.mrb[7].mxu1 }
 0x2c5   :  { %1773 = vst [vmem:[#allocation14 + $0x10] sm:$0xff] %v1741_v16  ;;  %v1712_v25 = vsel %vm1648_vm9, %v1414_v9, %v1680_v17  ;;  %v1424_v26 = vadd.f32 %v2059_v18, %v2581_v35  ;;  %v1171_v27 = vadd.f32 %v2576_v34, %v1170_v19  ;;  %v1419_v28 = vadd.f32 %v2581_v35, %v1418_v24 }
 0x2c6   :  { %v1744_v29 = vadd.f32 %v1712_v25, %v1616_v20  ;;  %v1615_v30 = vsel %vm1551_vm10, %v1161_v10, %v1583_v21  ;;  %vm1647_vm11 = vcmp.ge.f32.partialorder %v1409_v22, 0.0  ;;  %v1679_v31 = vmul.f32 0.01, %v1409_v22  ;;  %v1982_v32 = vpop.f32.mrb[8].mxu0 }
 0x2c7   :  { %vm1554_vm12 = vcmp.ge.f32.partialorder %v1176_v23, 0.0  ;;  %v1586_v33 = vmul.f32 0.01, %v1176_v23  ;;  %vm1650_vm13 = vcmp.ge.f32.partialorder %v1424_v26, 0.0  ;;  %v1682_v36 = vmul.f32 0.01, %v1424_v26 }
 0x2c8   :  { %1776 = vst [vmem:[#allocation14 + $0x28] sm:$0xff] %v1744_v29  ;;  %v1711_v37 = vsel %vm1647_vm11, %v1409_v22, %v1679_v31  ;;  %vm1553_vm14 = vcmp.ge.f32.partialorder %v1171_v27, 0.0  ;;  %v1585_v38 = vmul.f32 0.01, %v1171_v27  ;;  %vm1649_vm15 = vcmp.ge.f32.partialorder %v1419_v28, 0.0  ;;  %v2062_v39 = vpop.f32.mrb[8].mxu1 }
 0x2c9   :  { %v1180_v40 = vpop.f32.mrb[9].mxu0  ;;  %v1743_v41 = vadd.f32 %v1711_v37, %v1615_v30  ;;  %v1618_v42 = vsel %vm1554_vm12, %v1176_v23, %v1586_v33  ;;  %v1714_v43 = vsel %vm1650_vm13, %v1424_v26, %v1682_v36  ;;  %v1681_v44 = vmul.f32 0.01, %v1419_v28  ;;  %v1428_v45 = vpop.f32.mrb[9].mxu1 }
 0x2ca   :  { %v1746_v46 = vadd.f32 %v1714_v43, %v1618_v42  ;;  %v1617_v47 = vsel %vm1553_vm14, %v1171_v27, %v1585_v38  ;;  %v1186_v48 = vadd.f32 %v1982_v32, %v2576_v34  ;;  %v1434_v49 = vadd.f32 %v2062_v39, %v2581_v35  ;;  %v1985_v50 = vpop.f32.mrb[10].mxu0 }
 0x2cb   :  { %1775 = vst [vmem:[#allocation14 + $0x20] sm:$0xff] %v1743_v41  ;;  %v1713_v51 = vsel %vm1649_vm15, %v1419_v28, %v1681_v44  ;;  %v1181_v52 = vadd.f32 %v2576_v34, %v1180_v40  ;;  %v1429_v53 = vadd.f32 %v2581_v35, %v1428_v45  ;;  %v1196_v54 = vadd.f32 %v1985_v50, %v2576_v34  ;;  %v2065_v55 = vpop.f32.mrb[10].mxu1  ;;  %v1190_v56 = vpop.f32.mrb[11].mxu0 }
 0x2cc   :  { %1778 = vst [vmem:[#allocation14 + $0x38] sm:$0xff] %v1746_v46  ;;  %v1745_v57 = vadd.f32 %v1713_v51, %v1617_v47  ;;  %vm1556_vm0 = vcmp.ge.f32.partialorder %v1186_v48, 0.0  ;;  %v1588_v58 = vmul.f32 0.01, %v1186_v48  ;;  %vm1652_vm1 = vcmp.ge.f32.partialorder %v1434_v49, 0.0  ;;  %v1438_v59 = vpop.f32.mrb[11].mxu1 }
 0x2cd   :  { %v1684_v60 = vmul.f32 0.01, %v1434_v49  ;;  %vm1555_vm2 = vcmp.ge.f32.partialorder %v1181_v52, 0.0  ;;  %v1587_v61 = vmul.f32 0.01, %v1181_v52  ;;  %vm1651_vm3 = vcmp.ge.f32.partialorder %v1429_v53, 0.0 }
 0x2ce   :  { %1777 = vst [vmem:[#allocation14 + $0x30] sm:$0xff] %v1745_v57  ;;  %v1620_v62 = vsel %vm1556_vm0, %v1186_v48, %v1588_v58  ;;  %v1683_v63 = vmul.f32 0.01, %v1429_v53  ;;  %vm1558_vm4 = vcmp.ge.f32.partialorder %v1196_v54, 0.0  ;;  %v1590_v0 = vmul.f32 0.01, %v1196_v54 }
 0x2cf   :  { %v1988_v1 = vpop.f32.mrb[12].mxu0  ;;  %v1716_v2 = vsel %vm1652_vm1, %v1434_v49, %v1684_v60  ;;  %v1619_v3 = vsel %vm1555_vm2, %v1181_v52, %v1587_v61  ;;  %v1444_v4 = vadd.f32 %v2065_v55, %v2581_v35  ;;  %v1191_v5 = vadd.f32 %v2576_v34, %v1190_v56  ;;  %v2068_v6 = vpop.f32.mrb[12].mxu1 }
 0x2d0   :  { %v1200_v7 = vpop.f32.mrb[13].mxu0  ;;  %v1748_v8 = vadd.f32 %v1716_v2, %v1620_v62  ;;  %v1715_v9 = vsel %vm1651_vm3, %v1429_v53, %v1683_v63  ;;  %v1622_v10 = vsel %vm1558_vm4, %v1196_v54, %v1590_v0  ;;  %v1439_v11 = vadd.f32 %v2581_v35, %v1438_v59  ;;  %v1448_v12 = vpop.f32.mrb[13].mxu1 }
 0x2d1   :  { %v1747_v13 = vadd.f32 %v1715_v9, %v1619_v3  ;;  %vm1654_vm5 = vcmp.ge.f32.partialorder %v1444_v4, 0.0  ;;  %v1686_v14 = vmul.f32 0.01, %v1444_v4  ;;  %vm1557_vm6 = vcmp.ge.f32.partialorder %v1191_v5, 0.0 }
 0x2d2   :  { %1780 = vst [vmem:[#allocation14 + $0x48] sm:$0xff] %v1748_v8  ;;  %v1589_v15 = vmul.f32 0.01, %v1191_v5  ;;  %vm1653_vm7 = vcmp.ge.f32.partialorder %v1439_v11, 0.0  ;;  %v1685_v16 = vmul.f32 0.01, %v1439_v11  ;;  %v1206_v17 = vadd.f32 %v1988_v1, %v2576_v34 }
 0x2d3   :  { %v1991_v18 = vpop.f32.mrb[14].mxu0  ;;  %1779 = vst [vmem:[#allocation14 + $0x40] sm:$0xff] %v1747_v13  ;;  %v1718_v19 = vsel %vm1654_vm5, %v1444_v4, %v1686_v14  ;;  %v1454_v20 = vadd.f32 %v2068_v6, %v2581_v35  ;;  %v1201_v21 = vadd.f32 %v2576_v34, %v1200_v7  ;;  %v1449_v22 = vadd.f32 %v2581_v35, %v1448_v12  ;;  %v2071_v23 = vpop.f32.mrb[14].mxu1 }
 0x2d4   :  { %v1210_v24 = vpop.f32.mrb[15].mxu0  ;;  %v1750_v25 = vadd.f32 %v1718_v19, %v1622_v10  ;;  %v1621_v26 = vsel %vm1557_vm6, %v1191_v5, %v1589_v15  ;;  %v1717_v27 = vsel %vm1653_vm7, %v1439_v11, %v1685_v16  ;;  %vm1560_vm8 = vcmp.ge.f32.partialorder %v1206_v17, 0.0  ;;  %v1458_v28 = vpop.f32.mrb[15].mxu1 }
 0x2d5   :  { %v1749_v29 = vadd.f32 %v1717_v27, %v1621_v26  ;;  %v1592_v30 = vmul.f32 0.01, %v1206_v17  ;;  %vm1656_vm9 = vcmp.ge.f32.partialorder %v1454_v20, 0.0  ;;  %v1688_v31 = vmul.f32 0.01, %v1454_v20 }
 0x2d6   :  { %1782 = vst [vmem:[#allocation14 + $0x58] sm:$0xff] %v1750_v25  ;;  %vm1559_vm10 = vcmp.ge.f32.partialorder %v1201_v21, 0.0  ;;  %v1591_v32 = vmul.f32 0.01, %v1201_v21  ;;  %vm1655_vm11 = vcmp.ge.f32.partialorder %v1449_v22, 0.0  ;;  %v1216_v38 = vadd.f32 %v1991_v18, %v2576_v34  ;;  %v1994_v40 = vpop.f32.mrb[16].mxu0 }
 0x2d7   :  { %v1687_v33 = vmul.f32 0.01, %v1449_v22  ;;  %1781 = vst [vmem:[#allocation14 + $0x50] sm:$0xff] %v1749_v29  ;;  %v1624_v36 = vsel %vm1560_vm8, %v1206_v17, %v1592_v30  ;;  %v1720_v37 = vsel %vm1656_vm9, %v1454_v20, %v1688_v31  ;;  %v1464_v39 = vadd.f32 %v2071_v23, %v2581_v35  ;;  %v2074_v41 = vpop.f32.mrb[16].mxu1  ;;  %v1220_v46 = vpop.f32.mrb[17].mxu0 }
 0x2d8   :  { %v1752_v42 = vadd.f32 %v1720_v37, %v1624_v36  ;;  %v1623_v43 = vsel %vm1559_vm10, %v1201_v21, %v1591_v32  ;;  %v1211_v45 = vadd.f32 %v2576_v34, %v1210_v24  ;;  %v1468_v47 = vpop.f32.mrb[17].mxu1  ;;  %vm1562_vm12 = vcmp.ge.f32.partialorder %v1216_v38, 0.0 }
 0x2d9   :  { %v1719_v44 = vsel %vm1655_vm11, %v1449_v22, %v1687_v33  ;;  %v1594_v49 = vmul.f32 0.01, %v1216_v38  ;;  %vm1658_vm13 = vcmp.ge.f32.partialorder %v1464_v39, 0.0  ;;  %v1690_v50 = vmul.f32 0.01, %v1464_v39 }
 0x2da   :  { %v1751_v48 = vadd.f32 %v1719_v44, %v1623_v43  ;;  %1784 = vst [vmem:[#allocation14 + $0x68] sm:$0xff] %v1752_v42  ;;  %vm1561_vm14 = vcmp.ge.f32.partialorder %v1211_v45, 0.0  ;;  %v1593_v51 = vmul.f32 0.01, %v1211_v45  ;;  %v1459_v52 = vadd.f32 %v2581_v35, %v1458_v28  ;;  %v1997_v53 = vpop.f32.mrb[18].mxu0 }
 0x2db   :  { %v1626_v54 = vsel %vm1562_vm12, %v1216_v38, %v1594_v49  ;;  %v1226_v55 = vadd.f32 %v1994_v40, %v2576_v34  ;;  %v1474_v56 = vadd.f32 %v2074_v41, %v2581_v35  ;;  %v1221_v57 = vadd.f32 %v2576_v34, %v1220_v46  ;;  %v2077_v58 = vpop.f32.mrb[18].mxu1  ;;  %v1230_v59 = vpop.f32.mrb[19].mxu0 }
 0x2dc   :  { %1783 = vst [vmem:[#allocation14 + $0x60] sm:$0xff] %v1751_v48  ;;  %v1722_v60 = vsel %vm1658_vm13, %v1464_v39, %v1690_v50  ;;  %v1625_v61 = vsel %vm1561_vm14, %v1211_v45, %v1593_v51  ;;  %vm1657_vm15 = vcmp.ge.f32.partialorder %v1459_v52, 0.0  ;;  %v1689_v62 = vmul.f32 0.01, %v1459_v52  ;;  %v1478_v63 = vpop.f32.mrb[19].mxu1 }
 0x2dd   :  { %v1754_v0 = vadd.f32 %v1722_v60, %v1626_v54  ;;  %vm1564_vm0 = vcmp.ge.f32.partialorder %v1226_v55, 0.0  ;;  %v1596_v1 = vmul.f32 0.01, %v1226_v55  ;;  %vm1660_vm1 = vcmp.ge.f32.partialorder %v1474_v56, 0.0 }
 0x2de   :  { %v1721_v2 = vsel %vm1657_vm15, %v1459_v52, %v1689_v62  ;;  %v1692_v3 = vmul.f32 0.01, %v1474_v56  ;;  %vm1563_vm2 = vcmp.ge.f32.partialorder %v1221_v57, 0.0  ;;  %v1595_v4 = vmul.f32 0.01, %v1221_v57  ;;  %v2000_v5 = vpop.f32.mrb[20].mxu0 }
 0x2df   :  { %1786 = vst [vmem:[#allocation14 + $0x78] sm:$0xff] %v1754_v0  ;;  %v1753_v6 = vadd.f32 %v1721_v2, %v1625_v61  ;;  %v1628_v7 = vsel %vm1564_vm0, %v1226_v55, %v1596_v1  ;;  %v1469_v8 = vadd.f32 %v2581_v35, %v1468_v47  ;;  %v1236_v9 = vadd.f32 %v1997_v53, %v2576_v34  ;;  %v2080_v10 = vpop.f32.mrb[20].mxu1  ;;  %v1240_v11 = vpop.f32.mrb[21].mxu0 }
 0x2e0   :  { %v1724_v12 = vsel %vm1660_vm1, %v1474_v56, %v1692_v3  ;;  %v1627_v13 = vsel %vm1563_vm2, %v1221_v57, %v1595_v4  ;;  %v1484_v14 = vadd.f32 %v2077_v58, %v2581_v35  ;;  %v1231_v15 = vadd.f32 %v2576_v34, %v1230_v59  ;;  %v1488_v16 = vpop.f32.mrb[21].mxu1 }
 0x2e1   :  { %1785 = vst [vmem:[#allocation14 + $0x70] sm:$0xff] %v1753_v6  ;;  %v1756_v17 = vadd.f32 %v1724_v12, %v1628_v7  ;;  %vm1659_vm3 = vcmp.ge.f32.partialorder %v1469_v8, 0.0  ;;  %v1691_v18 = vmul.f32 0.01, %v1469_v8  ;;  %vm1566_vm4 = vcmp.ge.f32.partialorder %v1236_v9, 0.0 }
 0x2e2   :  { %v1598_v19 = vmul.f32 0.01, %v1236_v9  ;;  %vm1662_vm5 = vcmp.ge.f32.partialorder %v1484_v14, 0.0  ;;  %v1694_v20 = vmul.f32 0.01, %v1484_v14  ;;  %vm1565_vm6 = vcmp.ge.f32.partialorder %v1231_v15, 0.0 }
 0x2e3   :  { %1788 = vst [vmem:[#allocation14 + $0x88] sm:$0xff] %v1756_v17  ;;  %v1723_v21 = vsel %vm1659_vm3, %v1469_v8, %v1691_v18  ;;  %v1597_v22 = vmul.f32 0.01, %v1231_v15  ;;  %v1479_v23 = vadd.f32 %v2581_v35, %v1478_v63  ;;  %v1246_v24 = vadd.f32 %v2000_v5, %v2576_v34  ;;  %v2003_v25 = vpop.f32.mrb[22].mxu0  ;;  %v2083_v26 = vpop.f32.mrb[22].mxu1 }
 0x2e4   :  { %v1755_v27 = vadd.f32 %v1723_v21, %v1627_v13  ;;  %v1630_v28 = vsel %vm1566_vm4, %v1236_v9, %v1598_v19  ;;  %v1726_v29 = vsel %vm1662_vm5, %v1484_v14, %v1694_v20  ;;  %v1494_v30 = vadd.f32 %v2080_v10, %v2581_v35  ;;  %v1250_v31 = vpop.f32.mrb[23].mxu0  ;;  %v1498_v32 = vpop.f32.mrb[23].mxu1 }
 0x2e5   :  { %v1758_v33 = vadd.f32 %v1726_v29, %v1630_v28  ;;  %v1629_v36 = vsel %vm1565_vm6, %v1231_v15, %v1597_v22  ;;  %vm1661_vm7 = vcmp.ge.f32.partialorder %v1479_v23, 0.0  ;;  %v1693_v37 = vmul.f32 0.01, %v1479_v23 }
 0x2e6   :  { %1787 = vst [vmem:[#allocation14 + $0x80] sm:$0xff] %v1755_v27  ;;  %vm1568_vm8 = vcmp.ge.f32.partialorder %v1246_v24, 0.0  ;;  %v1600_v38 = vmul.f32 0.01, %v1246_v24  ;;  %vm1664_vm9 = vcmp.ge.f32.partialorder %v1494_v30, 0.0  ;;  %v1241_v41 = vadd.f32 %v2576_v34, %v1240_v11  ;;  %v2006_v44 = vpop.f32.mrb[24].mxu0 }
 0x2e7   :  { %v1696_v39 = vmul.f32 0.01, %v1494_v30  ;;  %1790 = vst [vmem:[#allocation14 + $0x98] sm:$0xff] %v1758_v33  ;;  %v1725_v40 = vsel %vm1661_vm7, %v1479_v23, %v1693_v37  ;;  %v1489_v42 = vadd.f32 %v2581_v35, %v1488_v16  ;;  %v1256_v43 = vadd.f32 %v2003_v25, %v2576_v34  ;;  %v2086_v45 = vpop.f32.mrb[24].mxu1  ;;  %v1260_v50 = vpop.f32.mrb[25].mxu0 }
 0x2e8   :  { %v1757_v46 = vadd.f32 %v1725_v40, %v1629_v36  ;;  %v1632_v47 = vsel %vm1568_vm8, %v1246_v24, %v1600_v38  ;;  %v1504_v49 = vadd.f32 %v2083_v26, %v2581_v35  ;;  %v1508_v51 = vpop.f32.mrb[25].mxu1  ;;  %vm1567_vm10 = vcmp.ge.f32.partialorder %v1241_v41, 0.0 }
 0x2e9   :  { %v1728_v48 = vsel %vm1664_vm9, %v1494_v30, %v1696_v39  ;;  %v1599_v53 = vmul.f32 0.01, %v1241_v41  ;;  %vm1663_vm11 = vcmp.ge.f32.partialorder %v1489_v42, 0.0  ;;  %v1695_v54 = vmul.f32 0.01, %v1489_v42 }
 0x2ea   :  { %v1760_v52 = vadd.f32 %v1728_v48, %v1632_v47  ;;  %1789 = vst [vmem:[#allocation14 + $0x90] sm:$0xff] %v1757_v46  ;;  %vm1570_vm12 = vcmp.ge.f32.partialorder %v1256_v43, 0.0  ;;  %v1602_v55 = vmul.f32 0.01, %v1256_v43  ;;  %vm1666_vm13 = vcmp.ge.f32.partialorder %v1504_v49, 0.0  ;;  %v2009_v60 = vpop.f32.mrb[26].mxu0 }
 0x2eb   :  { %v1631_v56 = vsel %vm1567_vm10, %v1241_v41, %v1599_v53  ;;  %v1698_v57 = vmul.f32 0.01, %v1504_v49  ;;  %v1251_v58 = vadd.f32 %v2576_v34, %v1250_v31  ;;  %v1499_v59 = vadd.f32 %v2581_v35, %v1498_v32  ;;  %v2089_v61 = vpop.f32.mrb[26].mxu1  ;;  %v1270_v2 = vpop.f32.mrb[27].mxu0 }
 0x2ec   :  { %1792 = vst [vmem:[#allocation14 + $0xa8] sm:$0xff] %v1760_v52  ;;  %v1727_v62 = vsel %vm1663_vm11, %v1489_v42, %v1695_v54  ;;  %v1634_v63 = vsel %vm1570_vm12, %v1256_v43, %v1602_v55  ;;  %v1266_v0 = vadd.f32 %v2006_v44, %v2576_v34  ;;  %v1514_v1 = vadd.f32 %v2086_v45, %v2581_v35  ;;  %v1518_v3 = vpop.f32.mrb[27].mxu1 }
 0x2ed   :  { %v1759_v4 = vadd.f32 %v1727_v62, %v1631_v56  ;;  %v1730_v5 = vsel %vm1666_vm13, %v1504_v49, %v1698_v57  ;;  %vm1569_vm14 = vcmp.ge.f32.partialorder %v1251_v58, 0.0  ;;  %v1601_v6 = vmul.f32 0.01, %v1251_v58 }
 0x2ee   :  { %v1762_v7 = vadd.f32 %v1730_v5, %v1634_v63  ;;  %vm1665_vm15 = vcmp.ge.f32.partialorder %v1499_v59, 0.0  ;;  %v1697_v8 = vmul.f32 0.01, %v1499_v59  ;;  %vm1572_vm0 = vcmp.ge.f32.partialorder %v1266_v0, 0.0  ;;  %v2012_v9 = vpop.f32.mrb[28].mxu0 }
 0x2ef   :  { %1791 = vst [vmem:[#allocation14 + $0xa0] sm:$0xff] %v1759_v4  ;;  %v1633_v10 = vsel %vm1569_vm14, %v1251_v58, %v1601_v6  ;;  %v1604_v11 = vmul.f32 0.01, %v1266_v0  ;;  %vm1668_vm1 = vcmp.ge.f32.partialorder %v1514_v1, 0.0  ;;  %v1700_v12 = vmul.f32 0.01, %v1514_v1 }
 0x2f0   :  { %v2092_v13 = vpop.f32.mrb[28].mxu1  ;;  %1794 = vst [vmem:[#allocation14 + $0xb8] sm:$0xff] %v1762_v7  ;;  %v1729_v14 = vsel %vm1665_vm15, %v1499_v59, %v1697_v8  ;;  %v1261_v15 = vadd.f32 %v2576_v34, %v1260_v50  ;;  %v1509_v16 = vadd.f32 %v2581_v35, %v1508_v51  ;;  %v1276_v17 = vadd.f32 %v2009_v60, %v2576_v34  ;;  %v1280_v18 = vpop.f32.mrb[29].mxu0 }
 0x2f1   :  { %v1528_v19 = vpop.f32.mrb[29].mxu1  ;;  %v1761_v20 = vadd.f32 %v1729_v14, %v1633_v10  ;;  %v1636_v21 = vsel %vm1572_vm0, %v1266_v0, %v1604_v11  ;;  %v1732_v22 = vsel %vm1668_vm1, %v1514_v1, %v1700_v12  ;;  %v1524_v23 = vadd.f32 %v2089_v61, %v2581_v35 }
 0x2f2   :  { %v1764_v24 = vadd.f32 %v1732_v22, %v1636_v21  ;;  %vm1571_vm2 = vcmp.ge.f32.partialorder %v1261_v15, 0.0  ;;  %v1603_v25 = vmul.f32 0.01, %v1261_v15  ;;  %vm1667_vm3 = vcmp.ge.f32.partialorder %v1509_v16, 0.0  ;;  %v2015_v26 = vpop.f32.mrb[30].mxu0 }
 0x2f3   :  { %1793 = vst [vmem:[#allocation14 + $0xb0] sm:$0xff] %v1761_v20  ;;  %v1699_v27 = vmul.f32 0.01, %v1509_v16  ;;  %vm1574_vm4 = vcmp.ge.f32.partialorder %v1276_v17, 0.0  ;;  %v1606_v28 = vmul.f32 0.01, %v1276_v17  ;;  %v1271_v31 = vadd.f32 %v2576_v34, %v1270_v2 }
 0x2f4   :  { %vm1670_vm5 = vcmp.ge.f32.partialorder %v1524_v23, 0.0  ;;  %1796 = vst [vmem:[#allocation14 + $0xc8] sm:$0xff] %v1764_v24  ;;  %v1635_v29 = vsel %vm1571_vm2, %v1261_v15, %v1603_v25  ;;  %v1702_v30 = vmul.f32 0.01, %v1524_v23  ;;  %v1519_v32 = vadd.f32 %v2581_v35, %v1518_v3  ;;  %v2095_v33 = vpop.f32.mrb[30].mxu1  ;;  %v1290_v36 = vpop.f32.mrb[31].mxu0 }
 0x2f5   :  { %v1731_v37 = vsel %vm1667_vm3, %v1509_v16, %v1699_v27  ;;  %v1638_v38 = vsel %vm1574_vm4, %v1276_v17, %v1606_v28  ;;  %v1286_v39 = vadd.f32 %v2012_v9, %v2576_v34  ;;  %v1534_v40 = vadd.f32 %v2092_v13, %v2581_v35  ;;  %v1538_v41 = vpop.f32.mrb[31].mxu1 }
 0x2f6   :  { %v1763_v42 = vadd.f32 %v1731_v37, %v1635_v29  ;;  %v1734_v43 = vsel %vm1670_vm5, %v1524_v23, %v1702_v30  ;;  %vm1573_vm6 = vcmp.ge.f32.partialorder %v1271_v31, 0.0  ;;  %v1605_v44 = vmul.f32 0.01, %v1271_v31 }
 0x2f7   :  { %v1766_v45 = vadd.f32 %v1734_v43, %v1638_v38  ;;  %vm1669_vm7 = vcmp.ge.f32.partialorder %v1519_v32, 0.0  ;;  %v1701_v46 = vmul.f32 0.01, %v1519_v32  ;;  %vm1576_vm8 = vcmp.ge.f32.partialorder %v1286_v39, 0.0 }
 0x2f8   :  { %1795 = vst [vmem:[#allocation14 + $0xc0] sm:$0xff] %v1763_v42  ;;  %v1637_v47 = vsel %vm1573_vm6, %v1271_v31, %v1605_v44  ;;  %v1608_v48 = vmul.f32 0.01, %v1286_v39  ;;  %vm1672_vm9 = vcmp.ge.f32.partialorder %v1534_v40, 0.0  ;;  %v1704_v49 = vmul.f32 0.01, %v1534_v40 }
 0x2f9   :  { %1798 = vst [vmem:[#allocation14 + $0xd8] sm:$0xff] %v1766_v45  ;;  %v1733_v50 = vsel %vm1669_vm7, %v1519_v32, %v1701_v46  ;;  %v1281_v51 = vadd.f32 %v2576_v34, %v1280_v18  ;;  %v1529_v52 = vadd.f32 %v2581_v35, %v1528_v19  ;;  %v1296_v53 = vadd.f32 %v2015_v26, %v2576_v34 }
 0x2fa   :  { %v1765_v54 = vadd.f32 %v1733_v50, %v1637_v47  ;;  %v1640_v55 = vsel %vm1576_vm8, %v1286_v39, %v1608_v48  ;;  %v1736_v56 = vsel %vm1672_vm9, %v1534_v40, %v1704_v49  ;;  %v1544_v57 = vadd.f32 %v2095_v33, %v2581_v35 }
 0x2fb   :  { %v1768_v58 = vadd.f32 %v1736_v56, %v1640_v55  ;;  %vm1575_vm10 = vcmp.ge.f32.partialorder %v1281_v51, 0.0  ;;  %v1607_v59 = vmul.f32 0.01, %v1281_v51  ;;  %vm1671_vm11 = vcmp.ge.f32.partialorder %v1529_v52, 0.0 }
 0x2fc   :  { %1797 = vst [vmem:[#allocation14 + $0xd0] sm:$0xff] %v1765_v54  ;;  %v1703_v60 = vmul.f32 0.01, %v1529_v52  ;;  %vm1578_vm12 = vcmp.ge.f32.partialorder %v1296_v53, 0.0  ;;  %v1610_v61 = vmul.f32 0.01, %v1296_v53  ;;  %v1291_v0 = vadd.f32 %v2576_v34, %v1290_v36 }
 0x2fd   :  { %vm1674_vm13 = vcmp.ge.f32.partialorder %v1544_v57, 0.0  ;;  %1800 = vst [vmem:[#allocation14 + $0xe8] sm:$0xff] %v1768_v58  ;;  %v1639_v62 = vsel %vm1575_vm10, %v1281_v51, %v1607_v59  ;;  %v1706_v63 = vmul.f32 0.01, %v1544_v57  ;;  %v1539_v1 = vadd.f32 %v2581_v35, %v1538_v41 }
 0x2fe   :  { %v1735_v2 = vsel %vm1671_vm11, %v1529_v52, %v1703_v60  ;;  %v1642_v3 = vsel %vm1578_vm12, %v1296_v53, %v1610_v61  ;;  %vm1577_vm14 = vcmp.ge.f32.partialorder %v1291_v0, 0.0  ;;  %v1609_v6 = vmul.f32 0.01, %v1291_v0 }
 0x2ff   :  { %v1767_v4 = vadd.f32 %v1735_v2, %v1639_v62  ;;  %v1738_v5 = vsel %vm1674_vm13, %v1544_v57, %v1706_v63  ;;  %vm1673_vm15 = vcmp.ge.f32.partialorder %v1539_v1, 0.0  ;;  %v1705_v8 = vmul.f32 0.01, %v1539_v1 }
 0x300   :  { %v1770_v7 = vadd.f32 %v1738_v5, %v1642_v3  ;;  %v1641_v9 = vsel %vm1577_vm14, %v1291_v0, %v1609_v6 }
 0x301   :  { %1799 = vst [vmem:[#allocation14 + $0xe0] sm:$0xff] %v1767_v4  ;;  %v1737_v10 = vsel %vm1673_vm15, %v1539_v1, %v1705_v8 }
 0x302   :  { %1802 = vst [vmem:[#allocation14 + $0xf8] sm:$0xff] %v1770_v7  ;;  %v1769_v11 = vadd.f32 %v1737_v10, %v1641_v9 }
 0x304   :  { %1801 = vst [vmem:[#allocation14 + $0xf0] sm:$0xff] %v1769_v11 }
 0x305   :  { %2352 = shalt.err (!%p2349_p0)
}
 0x306   :  { %s2353_s22 = scalar_lea.hbm %s2671_s8, 4096 }
 0x307   :  { %p2354_p1 = scmp.ne.s32.totalorder %s2671_s8, %s2353_s22  ;;  %p2357_p2 = scmp.lt.u32.totalorder %s2353_s22, %s2671_s8 }
 0x309   :  { %p2359_p3 = pnand %p2357_p2, %p2354_p1 }
 0x30b   :  { %2362 = shalt.err (!%p2359_p3)
}
 0x30c   :  { %1814 = dma.vmem_to_hbm [thread:$0]  %s1809_s7, 4096, %s2671_s8, [#allocation8], %s2372_s17, %s2372_s17, %s2373_s18  }
 0x30d   :  { %2369 = dma.done.wait [#allocation8], 4096  }
 0x30e   :  { %2370 = vsyncadd [#allocation8], 4294963200 }
 0x30f   :  { %1818 = vsyncpa [#allocation7], 1 }
 0x310   :  { %1819 = vsyncpa [#allocation10], 1 }
 0x311   :  { %1820 = vsyncpa [#allocation13], 1 }
 0x312   :  { %1821 = vsyncpa [#allocation8], 1 }

</bundles_post_ra>
